<compile_context>
chip_gen: v7x
topology: tpu7x:2x2x1
jax: 0.10.0
libtpu: 0.0.40
codegen_flags: <defaults>
</compile_context>

<pallas_src>
import functools
import math

import jax
import jax.numpy as jnp
from jax.experimental import pallas as pl
from jax.experimental.pallas import tpu as pltpu

# ----------------------------------------------------------------------------
# EfficientNet-B6 config
# ----------------------------------------------------------------------------
WIDTH_COEF = 1.8
DEPTH_COEF = 2.6
SE_RATIO = 0.25
BN_EPS = 1e-3
DIVISOR = 8
VMEM_LIMIT = 48 * 1024 * 1024   # safe on v5e/v6e (128 MiB) and v7x (64 MiB)

# (expand_ratio, kernel, stride, in_ch_base, out_ch_base, repeats_base)
BASE_BLOCKS = [
    (1, 3, 1, 32, 16, 1),
    (6, 3, 2, 16, 24, 2),
    (6, 5, 2, 24, 40, 2),
    (6, 3, 2, 40, 80, 3),
    (6, 5, 1, 80, 112, 3),
    (6, 5, 2, 112, 192, 4),
    (6, 3, 1, 192, 320, 1),
]


def round_filters(filters, width=WIDTH_COEF, divisor=DIVISOR):
    filters *= width
    new_f = max(divisor, int(filters + divisor / 2) // divisor * divisor)
    if new_f < 0.9 * filters:
        new_f += divisor
    return int(new_f)


def round_repeats(repeats, depth=DEPTH_COEF):
    return int(math.ceil(depth * repeats))


def build_block_cfgs():
    cfgs = []
    for (e, k, s, cin, cout, r) in BASE_BLOCKS:
        cin_r, cout_r, reps = round_filters(cin), round_filters(cout), round_repeats(r)
        for b in range(reps):
            bi = cin_r if b == 0 else cout_r
            cfgs.append(dict(expand=e, k=k, stride=(s if b == 0 else 1),
                             cin=bi, cout=cout_r, cexp=bi * e,
                             cse=max(1, int(bi * SE_RATIO))))
    return cfgs


def _tile(d, candidates):
    for c in candidates:
        if d >= c and d % c == 0:
            return c
    return d


def _same_pad(size, k, s):
    """TF-style SAME padding (Conv2dStaticSamePadding)."""
    out = -(-size // s)
    pad = max((out - 1) * s + k - size, 0)
    return out, pad // 2, pad - pad // 2


# ----------------------------------------------------------------------------
# Pallas kernels: fused matmul (+bias +act +residual)
# ----------------------------------------------------------------------------
def _apply_act(y, activation):
    if activation == "relu":
        return jnp.maximum(y, 0.0)
    if activation == "swish":
        return y * jax.nn.sigmoid(y)
    if activation == "sigmoid":
        return jax.nn.sigmoid(y)
    return y


def _matmul_kernel(a_ref, b_ref, bias_ref, o_ref, *, activation):
    y = jnp.dot(a_ref[...], b_ref[...], preferred_element_type=jnp.float32)
    y = y + bias_ref[...]
    o_ref[...] = _apply_act(y, activation).astype(o_ref.dtype)


def _matmul_res_kernel(a_ref, b_ref, bias_ref, res_ref, o_ref, *, activation):
    y = jnp.dot(a_ref[...], b_ref[...], preferred_element_type=jnp.float32)
    y = y + bias_ref[...] + res_ref[...].astype(jnp.float32)
    o_ref[...] = _apply_act(y, activation).astype(o_ref.dtype)


def matmul_bias_act(a, b, bias, residual=None, *, activation="none",
                    out_dtype=jnp.bfloat16):
    """(M,K)@(K,N) + bias (+ residual) with fused activation.

    bf16 operands, f32 MXU accumulation, weight kept resident (full K).
    """
    M, K = a.shape
    _, N = b.shape
    tm = _tile(M, (512, 256, 128, 64, 32, 16, 8))
    tn = _tile(N, (512, 384, 256, 128))
    assert M % tm == 0 and N % tn == 0, (M, tm, N, tn)
    a = a.astype(jnp.bfloat16)
    b = b.astype(jnp.bfloat16)
    bias2 = bias.reshape(1, N).astype(jnp.float32)

    in_specs = [
        pl.BlockSpec((tm, K), lambda i, j: (i, 0)),
        pl.BlockSpec((K, tn), lambda i, j: (0, j)),
        pl.BlockSpec((1, tn), lambda i, j: (0, j)),
    ]
    args = [a, b, bias2]
    if residual is None:
        kernel = functools.partial(_matmul_kernel, activation=activation)
    else:
        kernel = functools.partial(_matmul_res_kernel, activation=activation)
        in_specs.append(pl.BlockSpec((tm, tn), lambda i, j: (i, j)))
        args.append(residual.astype(jnp.bfloat16))

    return pl.pallas_call(
        kernel,
        out_shape=jax.ShapeDtypeStruct((M, N), out_dtype),
        grid_spec=pltpu.PrefetchScalarGridSpec(
            num_scalar_prefetch=0,
            grid=(M // tm, N // tn),
            in_specs=in_specs,
            out_specs=pl.BlockSpec((tm, tn), lambda i, j: (i, j)),
        ),
        compiler_params=pltpu.CompilerParams(
            dimension_semantics=("parallel", "parallel"),
            vmem_limit_bytes=VMEM_LIMIT),
    )(*args)


# ----------------------------------------------------------------------------
# projection matmul with SE-gate folded into the A prologue
# ----------------------------------------------------------------------------
def _proj_kernel(a_ref, s_ref, b_ref, bias_ref, o_ref):
    a = a_ref[...].astype(jnp.float32) * s_ref[0]          # (tm,K) * (1,K)
    y = jnp.dot(a.astype(jnp.bfloat16), b_ref[...],
                preferred_element_type=jnp.float32)
    y = y + bias_ref[...]
    o_ref[...] = y.astype(o_ref.dtype)


def _proj_res_kernel(a_ref, s_ref, b_ref, bias_ref, res_ref, o_ref):
    a = a_ref[...].astype(jnp.float32) * s_ref[0]
    y = jnp.dot(a.astype(jnp.bfloat16), b_ref[...],
                preferred_element_type=jnp.float32)
    y = y + bias_ref[...] + res_ref[...].astype(jnp.float32)
    o_ref[...] = y.astype(o_ref.dtype)


def proj_matmul_sescale(a, s, b, bias, residual=None, *, rows_per_sample,
                        out_dtype=jnp.bfloat16):
    """A:(M,K) bf16, s:(Nsamp,1,K) f32 per-sample SE gate, B:(K,N).

    The SE scale is applied as an A prologue inside the matmul kernel (free VPU
    filler under the MXU), so the scaled activation map never round-trips HBM.
    """
    M, K = a.shape
    _, N = b.shape
    nsamp = s.shape[0]
    assert M == nsamp * rows_per_sample
    if rows_per_sample % 8 != 0:
        # Tiny spatial maps (late stages at the test resolution): scale via a
        # cheap XLA broadcast multiply and use the plain fused matmul.
        a = (a.reshape(nsamp, rows_per_sample, K).astype(jnp.float32)
             * s).astype(jnp.bfloat16).reshape(M, K)
        return matmul_bias_act(a, b, bias, residual, activation="none",
                               out_dtype=out_dtype)

    tm = _tile(rows_per_sample, (512, 256, 128, 64, 32, 16, 8))
    tiles_per_sample = rows_per_sample // tm
    tn = _tile(N, (512, 384, 256, 128))
    assert N % tn == 0

    bias2 = bias.reshape(1, N).astype(jnp.float32)
    in_specs = [
        pl.BlockSpec((tm, K), lambda i, j: (i, 0)),
        pl.BlockSpec((1, 1, K), lambda i, j: (i // tiles_per_sample, 0, 0)),
        pl.BlockSpec((K, tn), lambda i, j: (0, j)),
        pl.BlockSpec((1, tn), lambda i, j: (0, j)),
    ]
    args = [a.astype(jnp.bfloat16), s.astype(jnp.float32),
            b.astype(jnp.bfloat16), bias2]
    if residual is None:
        kernel = _proj_kernel
    else:
        kernel = _proj_res_kernel
        in_specs.append(pl.BlockSpec((tm, tn), lambda i, j: (i, j)))
        args.append(residual.astype(jnp.bfloat16))

    return pl.pallas_call(
        kernel,
        out_shape=jax.ShapeDtypeStruct((M, N), out_dtype),
        grid_spec=pltpu.PrefetchScalarGridSpec(
            num_scalar_prefetch=0,
            grid=(M // tm, N // tn),
            in_specs=in_specs,
            out_specs=pl.BlockSpec((tm, tn), lambda i, j: (i, j)),
        ),
        compiler_params=pltpu.CompilerParams(
            dimension_semantics=("parallel", "parallel"),
            vmem_limit_bytes=VMEM_LIMIT),
    )(*args)


# ----------------------------------------------------------------------------
# depthwise conv (+folded BN +swish), stride 1 and 2, padding built in VMEM
# ----------------------------------------------------------------------------
def _dw_kernel(x_ref, w_ref, shift_ref, o_ref, xpad_ref, *,
               k, stride, h, w, oh, ow, ph0, pw0):
    c = o_ref.shape[-1]
    # Build the zero-padded f32 map in VMEM (no jnp.pad / HBM round trip; the
    # single up-cast here also removes k*k per-tap bf16->f32 converts).
    xpad_ref[...] = jnp.zeros_like(xpad_ref)
    xpad_ref[ph0:ph0 + h, pw0:pw0 + w, :] = x_ref[0].astype(jnp.float32)

    # Per-output-row f32 accumulator (fits the vreg file; the whole-map
    # accumulator of the previous version spilled to VMEM on every tap).
    @pl.loop(0, oh)
    def _(r):
        acc = jnp.zeros((ow, c), jnp.float32)
        for i in range(k):
            row = stride * r + i
            for j in range(k):
                if stride == 1:
                    win = xpad_ref[row, pl.ds(j, ow), :]
                else:
                    win = xpad_ref[row, pl.ds(j, ow, stride=stride), :]
                wij = w_ref[i, pl.ds(j, 1), :].astype(jnp.float32)      # (1, C)
                acc = acc + win * wij
        y = acc + shift_ref[...]
        y = y * jax.nn.sigmoid(y)                                       # swish
        o_ref[0, r] = y.astype(o_ref.dtype)


def depthwise_conv_bn_swish(x, w, shift, *, k, stride):
    """x: (N,H,W,C) bf16; w: (k,k,C) bf16 (BN scale folded); shift: (C,) f32."""
    N, H, W, C = x.shape
    OH, ph0, ph1 = _same_pad(H, k, stride)
    OW, pw0, pw1 = _same_pad(W, k, stride)
    Hp, Wp = H + ph0 + ph1, W + pw0 + pw1
    kernel = functools.partial(_dw_kernel, k=k, stride=stride, h=H, w=W,
                               oh=OH, ow=OW, ph0=ph0, pw0=pw0)
    # TODO(synk): at native B6 resolution (528x528) the per-sample padded map
    # should be OH-tiled with halo (grid (N, OH_tiles), parallel) to fit v7x's
    # 64 MiB VMEM and feed both TensorCores; whole-sample maps are fine here.
    return pl.pallas_call(
        kernel,
        out_shape=jax.ShapeDtypeStruct((N, OH, OW, C), jnp.bfloat16),
        grid_spec=pltpu.PrefetchScalarGridSpec(
            num_scalar_prefetch=0,
            grid=(N,),
            in_specs=[
                pl.BlockSpec((1, H, W, C), lambda n: (n, 0, 0, 0)),
                pl.BlockSpec((k, k, C), lambda n: (0, 0, 0)),
                pl.BlockSpec((1, C), lambda n: (0, 0)),
            ],
            out_specs=pl.BlockSpec((1, OH, OW, C), lambda n: (n, 0, 0, 0)),
            scratch_shapes=[pltpu.VMEM((Hp, Wp, C), jnp.float32)],
        ),
        compiler_params=pltpu.CompilerParams(
            dimension_semantics=("parallel",),
            vmem_limit_bytes=VMEM_LIMIT),
    )(x, w, shift.reshape(1, C))


# ----------------------------------------------------------------------------
# fused SE gate: GAP accumulation + FC(swish) + FC(sigmoid) in one kernel
# ----------------------------------------------------------------------------
def _se_gate_kernel(x_ref, w1_ref, b1_ref, w2_ref, b2_ref, o_ref, acc_ref, *,
                    inv_hw):
    @pl.when(pl.program_id(1) == 0)
    def _():
        acc_ref[...] = jnp.zeros_like(acc_ref)

    acc_ref[...] += jnp.sum(x_ref[0].astype(jnp.float32), axis=0, keepdims=True)

    @pl.when(pl.program_id(1) == pl.num_programs(1) - 1)
    def _():
        pooled = acc_ref[...] * inv_hw                                  # (1, C)
        z = jnp.dot(pooled.astype(jnp.bfloat16), w1_ref[...],
                    preferred_element_type=jnp.float32) + b1_ref[...]
        z = z * jax.nn.sigmoid(z)                                       # swish
        z = jnp.dot(z.astype(jnp.bfloat16), w2_ref[...],
                    preferred_element_type=jnp.float32) + b2_ref[...]
        o_ref[0] = jax.nn.sigmoid(z)                                    # (1, C)


def se_gate(x, w1, b1, w2, b2):
    """x: (N, HW, C) bf16 -> (N, 1, C) f32 sigmoid gate (GAP + 2 FCs fused)."""
    N, HW, C = x.shape
    Cse = w1.shape[1]
    thw = _tile(HW, (512, 256, 128, 64, 32, 16, 8))
    return pl.pallas_call(
        functools.partial(_se_gate_kernel, inv_hw=1.0 / HW),
        out_shape=jax.ShapeDtypeStruct((N, 1, C), jnp.float32),
        grid_spec=pltpu.PrefetchScalarGridSpec(
            num_scalar_prefetch=0,
            grid=(N, HW // thw),
            in_specs=[
                pl.BlockSpec((1, thw, C), lambda n, t: (n, t, 0)),
                pl.BlockSpec((C, Cse), lambda n, t: (0, 0)),
                pl.BlockSpec((1, Cse), lambda n, t: (0, 0)),
                pl.BlockSpec((Cse, C), lambda n, t: (0, 0)),
                pl.BlockSpec((1, C), lambda n, t: (0, 0)),
            ],
            out_specs=pl.BlockSpec((1, 1, C), lambda n, t: (n, 0, 0)),
            scratch_shapes=[pltpu.VMEM((1, C), jnp.float32)],
        ),
        compiler_params=pltpu.CompilerParams(
            dimension_semantics=("parallel", "arbitrary"),
            vmem_limit_bytes=VMEM_LIMIT),
    )(x, w1, b1.reshape(1, Cse), w2, b2.reshape(1, C))


# ----------------------------------------------------------------------------
# global average pool (HW-tiled accumulation) + fused classifier MLP
# ----------------------------------------------------------------------------
def _gap_kernel(x_ref, o_ref, acc_ref, *, inv_hw):
    @pl.when(pl.program_id(1) == 0)
    def _():
        acc_ref[...] = jnp.zeros_like(acc_ref)

    acc_ref[...] += jnp.sum(x_ref[0].astype(jnp.float32), axis=0, keepdims=True)

    @pl.when(pl.program_id(1) == pl.num_programs(1) - 1)
    def _():
        o_ref[0] = acc_ref[...] * inv_hw


def global_avg_pool(x):
    """x: (N, HW, C) -> (N, C) mean over HW."""
    N, HW, C = x.shape
    thw = _tile(HW, (512, 256, 128, 64, 32, 16, 8))
    out = pl.pallas_call(
        functools.partial(_gap_kernel, inv_hw=1.0 / HW),
        out_shape=jax.ShapeDtypeStruct((N, 1, C), jnp.float32),
        grid_spec=pltpu.PrefetchScalarGridSpec(
            num_scalar_prefetch=0,
            grid=(N, HW // thw),
            in_specs=[pl.BlockSpec((1, thw, C), lambda n, t: (n, t, 0))],
            out_specs=pl.BlockSpec((1, 1, C), lambda n, t: (n, 0, 0)),
            scratch_shapes=[pltpu.VMEM((1, C), jnp.float32)],
        ),
        compiler_params=pltpu.CompilerParams(
            dimension_semantics=("parallel", "arbitrary"),
            vmem_limit_bytes=VMEM_LIMIT),
    )(x)
    return out.reshape(N, C)


def _mlp_kernel(x_ref, w1, b1, w2, b2, w3, b3, w4, b4, o_ref):
    z = jnp.dot(x_ref[...].astype(jnp.bfloat16), w1[...],
                preferred_element_type=jnp.float32) + b1[...]
    z = jnp.maximum(z, 0.0)
    z = jnp.dot(z.astype(jnp.bfloat16), w2[...],
                preferred_element_type=jnp.float32) + b2[...]
    z = jnp.maximum(z, 0.0)
    z = jnp.dot(z.astype(jnp.bfloat16), w3[...],
                preferred_element_type=jnp.float32) + b3[...]
    z = jnp.maximum(z, 0.0)
    z = jnp.dot(z.astype(jnp.bfloat16), w4[...],
                preferred_element_type=jnp.float32) + b4[...]
    o_ref[...] = z


def classifier_mlp(feat, ws, bs):
    """2304->512->256->128->n_class MLP fused in one kernel (Dropout = identity)."""
    N = feat.shape[0]
    n_class = ws[-1].shape[1]
    args = [feat]
    for w_, b_ in zip(ws, bs):
        args += [w_, b_.reshape(1, -1).astype(jnp.float32)]
    return pl.pallas_call(
        _mlp_kernel,
        out_shape=jax.ShapeDtypeStruct((N, n_class), jnp.float32),
    )(*args)


# ----------------------------------------------------------------------------
# stem conv (3x3 s2 SAME, 3 input channels) via tiny im2col + fused matmul
# ----------------------------------------------------------------------------
def stem_conv(x, w2d, b):
    N, H, W, C = x.shape
    OH, ph0, ph1 = _same_pad(H, 3, 2)
    OW, pw0, pw1 = _same_pad(W, 3, 2)
    xp = jnp.pad(x, ((0, 0), (ph0, ph1), (pw0, pw1), (0, 0)))
    cols = [xp[:, i:i + 2 * (OH - 1) + 1:2, j:j + 2 * (OW - 1) + 1:2, :]
            for i in range(3) for j in range(3)]
    a = jnp.concatenate(cols, axis=-1).reshape(N * OH * OW, 9 * C)
    out = matmul_bias_act(a, w2d, b, activation="swish")
    return out.reshape(N, OH, OW, -1)


# ----------------------------------------------------------------------------
# jitted segments (stem / per-block / tail): blocks of equal shape share compiles
# ----------------------------------------------------------------------------
@jax.jit
def stem_forward(x_nchw, stem_w, stem_b):
    x = jnp.transpose(x_nchw, (0, 2, 3, 1)).astype(jnp.bfloat16)   # NCHW -> NHWC
    return stem_conv(x, stem_w, stem_b)


@functools.partial(jax.jit, static_argnames=("k", "stride", "use_skip"))
def mbconv_block(bp, x, *, k, stride, use_skip):
    N, H, W, Cin = x.shape
    inputs = x

    if "expand_w" in bp:
        Cexp = bp["expand_w"].shape[1]
        h = matmul_bias_act(x.reshape(N * H * W, Cin), bp["expand_w"],
                            bp["expand_b"], activation="swish")
        h = h.reshape(N, H, W, Cexp)
    else:
        Cexp = Cin
        h = x

    h = depthwise_conv_bn_swish(h, bp["dw_w"], bp["dw_b"], k=k, stride=stride)
    _, OH, OW, _ = h.shape
    h3 = h.reshape(N, OH * OW, Cexp)

    # SE gate: GAP + 2 FCs fused into one kernel -> (N, 1, Cexp) f32
    s = se_gate(h3, bp["se1_w"], bp["se1_b"], bp["se2_w"], bp["se2_b"])

    # project 1x1 conv + folded BN, SE gate folded into the A prologue,
    # residual fused into the epilogue.
    res = inputs.reshape(N * H * W, Cin) if use_skip else None
    out = proj_matmul_sescale(h3.reshape(N * OH * OW, Cexp), s, bp["proj_w"],
                              bp["proj_b"], residual=res,
                              rows_per_sample=OH * OW)
    Cout = bp["proj_w"].shape[1]
    return out.reshape(N, OH, OW, Cout)


@jax.jit
def head_forward(x, head_w, head_b, cls_ws, cls_bs):
    N, H, W, C = x.shape
    Chead = head_w.shape[1]
    h = matmul_bias_act(x.reshape(N * H * W, C), head_w, head_b,
                        activation="swish")
    h = h.reshape(N, H * W, Chead)
    feat = global_avg_pool(h)                       # adaptive_avg_pool2d(x, 1)
    return classifier_mlp(feat, cls_ws, cls_bs)


def forward(params, x_nchw):
    x = stem_forward(x_nchw, params["stem_w"], params["stem_b"])
    for bp, cfg in zip(params["blocks"], params["block_cfgs"]):
        use_skip = (cfg["stride"] == 1 and cfg["cin"] == cfg["cout"])
        x = mbconv_block(bp, x, k=cfg["k"], stride=cfg["stride"],
                         use_skip=use_skip)
    return head_forward(x, params["head_w"], params["head_b"],
                        params["cls_w"], params["cls_b"])


# ----------------------------------------------------------------------------
# parameter init (deterministic, synthetic; eval-mode BN folded; weights bf16)
# ----------------------------------------------------------------------------
class KeyGen:
    def __init__(self, key):
        self._key = key
        self._i = 0

    def __call__(self):
        self._i += 1
        return jax.random.fold_in(self._key, self._i)


def _bn_fold(c):
    gamma = jnp.ones((c,), jnp.float32)
    beta = jnp.zeros((c,), jnp.float32)
    mean = jnp.zeros((c,), jnp.float32)
    var = jnp.ones((c,), jnp.float32)
    scale = gamma / jnp.sqrt(var + BN_EPS)
    shift = beta - mean * scale
    return scale, shift


def init_model(seed, n_class):
    kg = KeyGen(jax.random.PRNGKey(seed))

    def nrm(shape, scale):
        return jax.random.normal(kg(), shape, dtype=jnp.float32) * scale

    params = {}
    stem_out = round_filters(32)                                  # 56
    w = nrm((3, 3, 3, stem_out), 1.0 / math.sqrt(27))
    sc, sh = _bn_fold(stem_out)
    params["stem_w"] = (w * sc).reshape(27, stem_out).astype(jnp.bfloat16)
    params["stem_b"] = sh

    cfgs = build_block_cfgs()
    blocks = []
    for cfg in cfgs:
        cin, cout = cfg["cin"], cfg["cout"]
        cexp, cse, k = cfg["cexp"], cfg["cse"], cfg["k"]
        bp = {}
        if cfg["expand"] != 1:
            w = nrm((cin, cexp), 1.0 / math.sqrt(cin))
            sc, sh = _bn_fold(cexp)
            bp["expand_w"] = (w * sc).astype(jnp.bfloat16)
            bp["expand_b"] = sh
        w = nrm((k, k, cexp), 1.0 / k)
        sc, sh = _bn_fold(cexp)
        bp["dw_w"] = (w * sc).astype(jnp.bfloat16)
        bp["dw_b"] = sh
        bp["se1_w"] = nrm((cexp, cse), 1.0 / math.sqrt(cexp)).astype(jnp.bfloat16)
        bp["se1_b"] = jnp.zeros((cse,), jnp.float32)
        bp["se2_w"] = nrm((cse, cexp), 1.0 / math.sqrt(cse)).astype(jnp.bfloat16)
        bp["se2_b"] = jnp.zeros((cexp,), jnp.float32)
        w = nrm((cexp, cout), 1.0 / math.sqrt(cexp))
        sc, sh = _bn_fold(cout)
        bp["proj_w"] = (w * sc).astype(jnp.bfloat16)
        bp["proj_b"] = sh
        blocks.append(bp)
    params["blocks"] = blocks
    params["block_cfgs"] = cfgs

    head_in, head_out = round_filters(320), round_filters(1280)   # 576 -> 2304
    w = nrm((head_in, head_out), 1.0 / math.sqrt(head_in))
    sc, sh = _bn_fold(head_out)
    params["head_w"] = (w * sc).astype(jnp.bfloat16)
    params["head_b"] = sh

    # classifier MLP (nn.init.normal_(w, 0, 0.01), bias 0); the unused self.l0
    # Linear in the reference module is never called in forward, so not created.
    dims = [head_out, 512, 256, 128, n_class]
    cls_w, cls_b = [], []
    for i in range(4):
        cls_w.append(nrm((dims[i], dims[i + 1]), 0.01).astype(jnp.bfloat16))
        cls_b.append(jnp.zeros((dims[i + 1],), jnp.float32))
    params["cls_w"] = tuple(cls_w)
    params["cls_b"] = tuple(cls_b)
    return params


# ----------------------------------------------------------------------------
if __name__ == "__main__":
    n_class = 4
    params = init_model(seed=0, n_class=n_class)

    key = jax.random.PRNGKey(0)
    x = jax.random.normal(key, (2, 3, 64, 64), dtype=jnp.float32)   # NCHW

    out = forward(params, x)
    out = jax.block_until_ready(out)
    assert out.shape == (2, n_class), out.shape
    assert bool(jnp.all(jnp.isfinite(out)))
    print("KERNEL_OK")
</pallas_src>

<mosaic_0001>
module attributes {stable_mosaic.version = 11 : i64} {
  func.func @_matmul_kernel(%arg0: i32, %arg1: i32, %arg2: memref<512x27xbf16, #tpu.memory_space<vmem>>, %arg3: memref<27x56xbf16, #tpu.memory_space<vmem>>, %arg4: memref<1x56xf32, #tpu.memory_space<vmem>>, %arg5: memref<512x56xbf16, #tpu.memory_space<vmem>>) attributes {dimension_semantics = [#tpu.dimension_semantics<parallel>, #tpu.dimension_semantics<parallel>], iteration_bounds = array<i64: 4, 1>, scalar_prefetch = 0 : i64, scratch_operands = 0 : i64, tpu.core_type = #tpu.core_type<tc>, window_params = [{transform_indices = @transform_0, window_bounds = array<i64: 512, 27>}, {transform_indices = @transform_1, window_bounds = array<i64: 27, 56>}, {transform_indices = @transform_2, window_bounds = array<i64: 1, 56>}, {transform_indices = @transform_3, window_bounds = array<i64: 512, 56>}]} {
    %c0 = arith.constant 0 : index
    %c0_0 = arith.constant 0 : index
    %0 = vector.load %arg2[%c0, %c0_0] : memref<512x27xbf16, #tpu.memory_space<vmem>>, vector<512x27xbf16>
    %c0_1 = arith.constant 0 : index
    %c0_2 = arith.constant 0 : index
    %1 = vector.load %arg3[%c0_1, %c0_2] : memref<27x56xbf16, #tpu.memory_space<vmem>>, vector<27x56xbf16>
    %cst = arith.constant dense<0.000000e+00> : vector<512x56xf32>
    %2 = tpu.matmul %0, %1, %cst {dimension_numbers = #tpu.dot_dimension_numbers<[1], [0], [0], [1], [0, 0, 1, 1], [], []>} : vector<512x27xbf16>, vector<27x56xbf16>, vector<512x56xf32> -> vector<512x56xf32>
    %c0_3 = arith.constant 0 : index
    %c0_4 = arith.constant 0 : index
    %3 = vector.load %arg4[%c0_3, %c0_4] : memref<1x56xf32, #tpu.memory_space<vmem>>, vector<1x56xf32>
    %4 = vector.broadcast %3 : vector<1x56xf32> to vector<512x56xf32>
    %5 = arith.addf %2, %4 : vector<512x56xf32>
    %6 = arith.negf %5 : vector<512x56xf32>
    %7 = math.exp %6 : vector<512x56xf32>
    %cst_5 = arith.constant 1.000000e+00 : f32
    %8 = vector.broadcast %cst_5 : f32 to vector<512x56xf32>
    %9 = arith.addf %8, %7 : vector<512x56xf32>
    %10 = arith.divf %8, %9 : vector<512x56xf32>
    %11 = arith.mulf %5, %10 : vector<512x56xf32>
    %12 = arith.truncf %11 : vector<512x56xf32> to vector<512x56xbf16>
    %c0_6 = arith.constant 0 : index
    %c0_7 = arith.constant 0 : index
    %13 = vector.load %arg5[%c0_6, %c0_7] : memref<512x56xbf16, #tpu.memory_space<vmem>>, vector<512x56xbf16>
    tpu.vector_store %arg5[%c0_6, %c0_7], %12 {strides = array<i32>} : memref<512x56xbf16, #tpu.memory_space<vmem>>, vector<512x56xbf16>,
    return
  }
  func.func @transform_0(%arg0: i32, %arg1: i32) -> (i32, i32) {
    %c0_i32 = arith.constant 0 : i32
    %c0_i32_0 = arith.constant 0 : i32
    return %arg0, %c0_i32 : i32, i32
  }
  func.func @transform_1(%arg0: i32, %arg1: i32) -> (i32, i32) {
    %c0_i32 = arith.constant 0 : i32
    %c0_i32_0 = arith.constant 0 : i32
    return %c0_i32, %arg1 : i32, i32
  }
  func.func @transform_2(%arg0: i32, %arg1: i32) -> (i32, i32) {
    %c0_i32 = arith.constant 0 : i32
    %c0_i32_0 = arith.constant 0 : i32
    return %c0_i32, %arg1 : i32, i32
  }
  func.func @transform_3(%arg0: i32, %arg1: i32) -> (i32, i32) {
    %c0_i32 = arith.constant 0 : i32
    return %arg0, %arg1 : i32, i32
  }
}

</mosaic_0001>

<bundles_post_ra>
// kernel: stem_forward.1
= control target key start
LH: loop header
LB: loop body
LE: loop exit
PB: predicated region body
PF: predicated region fallthrough
CT: control target
= control target key end

     0   :  { %8 = vsyncpa [#allocation3], 0  ;;  %s3337_s0 = inlined_call_operand.vmem [shape: bf16[2048,27], index: 0, kind: input, shape index: {}]   ;;  %s3338_s1 = inlined_call_operand.vmem [shape: bf16[27,56], index: 1, kind: input, shape index: {}]   ;;  %s3339_s2 = inlined_call_operand.vmem [shape: f32[1,56], index: 2, kind: input, shape index: {}]   ;;  %s3340_s3 = inlined_call_operand.hbm [shape: bf16[2048,56], index: 3, kind: output, shape index: {}]  }
   0x1   :  { %10 = vsyncpa [#allocation3 + $0x1], 0  ;;  %s2574_s12 = smov 0   ;;  %s2576_s13 = smov 0  }
   0x2   :  { %s2578_s14 = smov 0   ;;  %s2580_s15 = smov 0  }
   0x3   :  { %s2582_s16 = smov 0   ;;  %s2584_s17 = smov 0  }
   0x4 LB: > { %s1740_s18 = sadd.s32 4294967295, %s2548_s17   ;;  %s1741_s19 = sadd.s32 4294967294, %s2548_s17   ;;  %s2548_s17 = sphi %s2584_s17, %s16_s17   ;;  %s2544_s16 = sphi %s2582_s16, %s3351_s16   ;;  %s2540_s15 = sphi %s2580_s15, %s3350_s15   ;;  %s2536_s14 = sphi %s2578_s14, %s3349_s14   ;;  %s2532_s13 = sphi %s2576_s13, %s3348_s13   ;;  %s2528_s12 = sphi %s2574_s12, %s3347_s12  }
   0x5   : > { %s28_s20 = sadd.s32 1, %s2544_s16  ;;  %s115_s21 = sadd.s32 1, %s2536_s14 }
   0x6   : > { %p30_p0 = scmp.ge.s32.totalorder %s28_s20, 4  ;;  %p125_p1 = scmp.ne.s32.totalorder %s2536_s14, %s2532_s13 }
   0x7   : > { %p126_p2 = scmp.eq.s32.totalorder %s1740_s18, 3  ;;  %p131_p3 = scmp.ne.s32.totalorder %s2532_s13, %s2528_s12 }
   0x8   : > { %s3353_s20 = smov (%p30_p0, %s28_s20), 0  ;;  %p132_p5 = scmp.eq.s32.totalorder %s1741_s19, 3 }
   0x9   : > { %p2614_p4 = por %p126_p2, %p125_p1  ;;  %s110_s23 = ssub.s32 %s2544_s16, %s3353_s20 }
   0xa   : > { %p1746_p6 = scmp.ge.s32.totalorder %s2548_s17, 1  ;;  %p113_p7 = scmp.eq.s32.totalorder %s110_s23, 0 }
   0xb   : > { %p2621_p8 = por %p132_p5, %p131_p3  ;;  %p172_p9 = scmp.lt.s32.totalorder %s2548_s17, 5 }
   0xc   : > { %s2627_s25 = scalar_select %p113_p7, %s2536_s14, %s115_s21  }
   0xd   : > { %p173_p10 = pnand %p1746_p6, %p172_p9 }
   0xf   : > { %176 = sbr.rel (%p173_p10) target bundleno = 408 (0x198), region = 32 }
  0x16   : > { %v2179_v0 = vld [vmem:[%s3338_s1] sm:$0xff]   ;;  %vm561_vm0 = vcmask 1044480   ;;  %v2180_v1 = vld [vmem:[%s3338_s1 + $0x8] sm:$0x3f]   ;;  %vm562_vm1 = vcmask 1045504   ;;  %s1748_s30 = sshll.u32 %s2540_s15, 6 }
  0x17   : > { %2049 = vmatprep.subr.bf16.mxu0 %v2179_v0  ;;  %2117 = vmatprep.subr.bf16.mxu1 %v2179_v0  ;;  %v2550_v2 = vmov 65535   ;;  %p204_p11 = scmp.lt.s32.totalorder %s1748_s30, 255  ;;  %vm464_vm2 = vcmask 220160   ;;  %v2708_v38 = vld [vmem:[%s3339_s2] ss:$0 sm:$0xff]  ;;  %vm1561_vm3 = vcmask 453632  }
  0x18   : > { %2050 = vmatpush3.bf16.msra.mxu0 %v2179_v0  ;;  %2119 = vmatpush3.bf16.msra.mxu1 %v2179_v0  ;;  %v563_v3 = vsel %vm561_vm0, 4294967295, %v2550_v2  ;;  %s200_s10 = sand.u32 1, %s2532_s13   ;;  %s2014_s23 = sshll.u32 %s2540_s15, 12 }
  0x19   : > { %v564_v4 = vsel %vm562_vm1, %v563_v3, 0  ;;  %s3355_s30 = smov (!%p204_p11, %s1748_s30), 255  ;;  %s2800_s11 = sshll.u32 %s200_s10, 8 }
  0x1a   : > { %v566_v5 = vand.u32 %v2180_v1, %v564_v4  ;;  %s1749_s4 = sshll.u32 %s3355_s30, 2  ;;  %s2834_s18 = scalar_lea.vmem [#allocation2], %s2800_s11 }
  0x1b   : > { %s2639_s7 = scalar_lea.vmem %s3337_s0, %s1749_s4  ;;  %s1641_s26 = sshll.u32 %s2834_s18, 4  ;;  %s3281_s26 = int_to_ptr.vmem [resolvable:$true] %s1641_s26 }
  0x1c   : > { %2051 = vmatprep.subr.bf16.mxu0 %v566_v5  ;;  %2118 = vmatprep.subr.bf16.mxu1 %v566_v5  ;;  %v2181_v6 = vld [vmem:[%s2639_s7] sm:$0xff]   ;;  %v2183_v8 = vld [vmem:[%s2639_s7 + $0x8] sm:$0xff]   ;;  %v2185_v10 = vld [vmem:[%s2639_s7 + $0x10] sm:$0xff]   ;;  %s3277_s28 = scalar_lea.hbm %s3340_s3, %s2014_s23  ;;  %s3291_s29 = scalar_lea.sflag [#allocation3], %s200_s10 }
  0x1d   : > { %2052 = vmatpush3.bf16.msra.mxu0 %v566_v5  ;;  %2120 = vmatpush3.bf16.msra.mxu1 %v566_v5  ;;  %v2182_v7 = vld [vmem:[%s2639_s7 + $0x80] sm:$0xff]   ;;  %v2184_v9 = vld [vmem:[%s2639_s7 + $0x88] sm:$0xff]   ;;  %v2186_v11 = vld [vmem:[%s2639_s7 + $0x90] sm:$0xff]   ;;  %s2470_s30 = scalar_lea.vmem %s3281_s26, 4096  ;;  %s2551_s4 = smov [#allocation2]  }
  0x1e   : > { %2053 = vmatprep.mubr.msk.bf16.mxu0 %vm464_vm2, %v2181_v6  ;;  %2085 = vmatprep.mubr.msk.bf16.mxu1 %vm464_vm2, %v2182_v7  ;;  %v2187_v12 = vld [vmem:[%s2639_s7 + $0x18] sm:$0xff]   ;;  %v2189_v14 = vld [vmem:[%s2639_s7 + $0x20] sm:$0xff]   ;;  %v2191_v16 = vld [vmem:[%s2639_s7 + $0x28] sm:$0xff]   ;;  %p2471_p12 = scmp.ne.s32.totalorder %s3281_s26, %s2470_s30  ;;  %s2474_s5 = sshll.u32 %s2551_s4, 4  ;;  %s2475_s5 = int_to_ptr.vmem [resolvable:$false] %s2474_s5 }
  0x1f   : > { %v2188_v13 = vld [vmem:[%s2639_s7 + $0x98] sm:$0xff]   ;;  %v2190_v15 = vld [vmem:[%s2639_s7 + $0xa0] sm:$0xff]   ;;  %v2192_v17 = vld [vmem:[%s2639_s7 + $0xa8] sm:$0xff]   ;;  %s2476_s6 = scalar_lea.vmem %s2475_s5, 8192  ;;  %p2477_p1 = scmp.lt.s32.totalorder %s3281_s26, %s2475_s5 }
  0x20   : > { %2054 = vmatmul.mubr.msk.bf16.vlgmr.msra.gmra.mrb[0].mxu0 %vm464_vm2, %v2183_v8  ;;  %2086 = vmatmul.mubr.msk.bf16.vlgmr.msra.gmra.mrb[0].mxu1 %vm464_vm2, %v2184_v9  ;;  %v2193_v18 = vld [vmem:[%s2639_s7 + $0x30] sm:$0xff]   ;;  %v2195_v20 = vld [vmem:[%s2639_s7 + $0x38] sm:$0xff]   ;;  %v2197_v22 = vld [vmem:[%s2639_s7 + $0x40] sm:$0xff]   ;;  %p2472_p13 = pnand %p2471_p12, %p2614_p4  ;;  %p2478_p2 = scmp.lt.s32.totalorder %s2476_s6, %s2470_s30 }
  0x21   : > { %2057 = vmatprep.mubr.msk.bf16.mxu0 %vm464_vm2, %v2185_v10  ;;  %2089 = vmatprep.mubr.msk.bf16.mxu1 %vm464_vm2, %v2186_v11  ;;  %v2194_v19 = vld [vmem:[%s2639_s7 + $0xb0] sm:$0xff]   ;;  %v2196_v21 = vld [vmem:[%s2639_s7 + $0xb8] sm:$0xff]   ;;  %v2198_v23 = vld [vmem:[%s2639_s7 + $0xc0] sm:$0xff]  }
  0x22   : > { %v2199_v24 = vld [vmem:[%s2639_s7 + $0x48] sm:$0xff]   ;;  %v2201_v26 = vld [vmem:[%s2639_s7 + $0x50] sm:$0xff]   ;;  %v2203_v28 = vld [vmem:[%s2639_s7 + $0x58] sm:$0xff]   ;;  %p2473_p0 = pneg %p2472_p13  ;;  %p2479_p3 = por %p2478_p2, %p2477_p1 }
  0x23   : > { %v2200_v25 = vld [vmem:[%s2639_s7 + $0xc8] sm:$0xff]   ;;  %v2202_v27 = vld [vmem:[%s2639_s7 + $0xd0] sm:$0xff]   ;;  %v2204_v29 = vld [vmem:[%s2639_s7 + $0xd8] sm:$0xff]  }
  0x24   : > { %v2205_v30 = vld [vmem:[%s2639_s7 + $0x60] sm:$0xff]   ;;  %v2207_v32 = vld [vmem:[%s2639_s7 + $0x68] sm:$0xff]   ;;  %v2209_v34 = vld [vmem:[%s2639_s7 + $0x70] sm:$0xff]   ;;  %p2480_p5 = pnand %p2479_p3, %p2473_p0 }
  0x25   : > { %v2206_v31 = vld [vmem:[%s2639_s7 + $0xe0] sm:$0xff]   ;;  %v2208_v33 = vld [vmem:[%s2639_s7 + $0xe8] sm:$0xff]   ;;  %v2210_v35 = vld [vmem:[%s2639_s7 + $0xf0] sm:$0xff]  }
  0x26   : > { %v2211_v36 = vld [vmem:[%s2639_s7 + $0x78] sm:$0xff]  }
  0x27   : > { %v2212_v37 = vld [vmem:[%s2639_s7 + $0xf8] sm:$0xff]  }
  0x28   : > { %2058 = vmatmul.mubr.msk.bf16.gmra.mrb[4].mxu0 %vm464_vm2, %v2187_v12  ;;  %2090 = vmatmul.mubr.msk.bf16.gmra.mrb[4].mxu1 %vm464_vm2, %v2188_v13 }
  0x29   : > { %2061 = vmatprep.mubr.msk.bf16.mxu0 %vm464_vm2, %v2189_v14  ;;  %2093 = vmatprep.mubr.msk.bf16.mxu1 %vm464_vm2, %v2190_v15 }
  0x30   : > { %2062 = vmatmul.mubr.msk.bf16.gmra.mrb[8].mxu0 %vm464_vm2, %v2191_v16  ;;  %2094 = vmatmul.mubr.msk.bf16.gmra.mrb[8].mxu1 %vm464_vm2, %v2192_v17 }
  0x31   : > { %2065 = vmatprep.mubr.msk.bf16.mxu0 %vm464_vm2, %v2193_v18  ;;  %2097 = vmatprep.mubr.msk.bf16.mxu1 %vm464_vm2, %v2194_v19 }
  0x38   : > { %2066 = vmatmul.mubr.msk.bf16.gmra.mrb[12].mxu0 %vm464_vm2, %v2195_v20  ;;  %2098 = vmatmul.mubr.msk.bf16.gmra.mrb[12].mxu1 %vm464_vm2, %v2196_v21 }
  0x39   : > { %2069 = vmatprep.mubr.msk.bf16.mxu0 %vm464_vm2, %v2197_v22  ;;  %2101 = vmatprep.mubr.msk.bf16.mxu1 %vm464_vm2, %v2198_v23 }
  0x40   : > { %2070 = vmatmul.mubr.msk.bf16.gmra.mrb[16].mxu0 %vm464_vm2, %v2199_v24  ;;  %2102 = vmatmul.mubr.msk.bf16.gmra.mrb[16].mxu1 %vm464_vm2, %v2200_v25 }
  0x41   : > { %2073 = vmatprep.mubr.msk.bf16.mxu0 %vm464_vm2, %v2201_v26  ;;  %2105 = vmatprep.mubr.msk.bf16.mxu1 %vm464_vm2, %v2202_v27 }
  0x48   : > { %2074 = vmatmul.mubr.msk.bf16.gmra.mrb[20].mxu0 %vm464_vm2, %v2203_v28  ;;  %2106 = vmatmul.mubr.msk.bf16.gmra.mrb[20].mxu1 %vm464_vm2, %v2204_v29 }
  0x49   : > { %2077 = vmatprep.mubr.msk.bf16.mxu0 %vm464_vm2, %v2205_v30  ;;  %2109 = vmatprep.mubr.msk.bf16.mxu1 %vm464_vm2, %v2206_v31 }
  0x50   : > { %2078 = vmatmul.mubr.msk.bf16.gmra.mrb[24].mxu0 %vm464_vm2, %v2207_v32  ;;  %2110 = vmatmul.mubr.msk.bf16.gmra.mrb[24].mxu1 %vm464_vm2, %v2208_v33 }
  0x51   : > { %2081 = vmatprep.mubr.msk.bf16.mxu0 %vm464_vm2, %v2209_v34  ;;  %2113 = vmatprep.mubr.msk.bf16.mxu1 %vm464_vm2, %v2210_v35 }
  0x58   : > { %2082 = vmatmul.mubr.msk.bf16.gmra.mrb[28].mxu0 %vm464_vm2, %v2211_v36  ;;  %2114 = vmatmul.mubr.msk.bf16.gmra.mrb[28].mxu1 %vm464_vm2, %v2212_v37 }
  0xf3   : > { %v2055_v39 = vpop.f32.mrb[0].mxu0  ;;  %v2087_v41 = vpop.f32.mrb[0].mxu1 }
  0xf4   : > { %v2711_v40 = vadd.f32 %v2055_v39, %v2708_v38  ;;  %v602_v42 = vpop.f32.mrb[1].mxu0  ;;  %v2714_v43 = vadd.f32 %v2087_v41, %v2708_v38  ;;  %v730_v45 = vpop.f32.mrb[1].mxu1 }
  0xf5   : > { %v2717_v44 = vadd.f32 %v2708_v38, %v602_v42  ;;  %v2056_v46 = vpop.f32.mrb[2].mxu0  ;;  %v2721_v48 = vadd.f32 %v2708_v38, %v730_v45  ;;  %v2088_v50 = vpop.f32.mrb[2].mxu1 }
  0xf6   : > { %v1819_v47 = vmul.f32 -1.442695, %v2711_v40  ;;  %v2724_v49 = vadd.f32 %v2056_v46, %v2708_v38  ;;  %v605_v51 = vpop.f32.mrb[3].mxu0  ;;  %v1851_v52 = vmul.f32 -1.442695, %v2714_v43  ;;  %v2729_v54 = vadd.f32 %v2088_v50, %v2708_v38  ;;  %v733_v56 = vpop.f32.mrb[3].mxu1 }
  0xf7   : > { %v1817_v53 = vmul.f32 -1.442695, %v2717_v44  ;;  %v2732_v55 = vadd.f32 %v2708_v38, %v605_v51  ;;  %v1849_v57 = vmul.f32 -1.442695, %v2721_v48  ;;  %v2737_v59 = vadd.f32 %v2708_v38, %v733_v56 }
  0xf8   : > { %2213 = vpow2.f32 %v1819_v47  ;;  %v1820_v58 = vmul.f32 -1.442695, %v2724_v49  ;;  %v1852_v60 = vmul.f32 -1.442695, %v2729_v54 }
  0xf9   : > { %2215 = vpow2.f32 %v1851_v52  ;;  %v1818_v61 = vmul.f32 -1.442695, %v2732_v55  ;;  %v1850_v62 = vmul.f32 -1.442695, %v2737_v59 }
  0xfa   : > { %2217 = vpow2.f32 %v1817_v53 }
  0xfb   : > { %2219 = vpow2.f32 %v1849_v57  ;;  %v2059_v63 = vpop.f32.mrb[4].mxu0  ;;  %v2091_v1 = vpop.f32.mrb[4].mxu1 }
  0xfc   : > { %2221 = vpow2.f32 %v1820_v58  ;;  %v2743_v0 = vadd.f32 %v2059_v63, %v2708_v38  ;;  %v618_v2 = vpop.f32.mrb[5].mxu0  ;;  %v2746_v3 = vadd.f32 %v2091_v1, %v2708_v38  ;;  %v746_v5 = vpop.f32.mrb[5].mxu1 }
  0xfd   : > { %2223 = vpow2.f32 %v1852_v60  ;;  %v2749_v4 = vadd.f32 %v2708_v38, %v618_v2  ;;  %v2060_v6 = vpop.f32.mrb[6].mxu0  ;;  %v2753_v8 = vadd.f32 %v2708_v38, %v746_v5  ;;  %v2092_v10 = vpop.f32.mrb[6].mxu1 }
  0xfe   : > { %2225 = vpow2.f32 %v1818_v61  ;;  %v1823_v7 = vmul.f32 -1.442695, %v2743_v0  ;;  %v2756_v9 = vadd.f32 %v2060_v6, %v2708_v38  ;;  %v621_v11 = vpop.f32.mrb[7].mxu0  ;;  %v1855_v12 = vmul.f32 -1.442695, %v2746_v3  ;;  %v749_v14 = vpop.f32.mrb[7].mxu1 }
  0xff   : > { %2227 = vpow2.f32 %v1850_v62  ;;  %v1821_v13 = vmul.f32 -1.442695, %v2749_v4  ;;  %v1853_v15 = vmul.f32 -1.442695, %v2753_v8  ;;  %v2765_v39 = vadd.f32 %v2092_v10, %v2708_v38 }
 0x100   : > { %2229 = vpow2.f32 %v1823_v7  ;;  %v1824_v16 = vmul.f32 -1.442695, %v2756_v9  ;;  %v2768_v45 = vadd.f32 %v2708_v38, %v621_v11  ;;  %v2771_v50 = vadd.f32 %v2708_v38, %v749_v14 }
 0x101   : > { %2231 = vpow2.f32 %v1855_v12  ;;  %v1856_v61 = vmul.f32 -1.442695, %v2765_v39 }
 0x102   : > { %v2214_v17 = vpop.eup %2213  ;;  %2233 = vpow2.f32 %v1821_v13  ;;  %v1822_v6 = vmul.f32 -1.442695, %v2768_v45  ;;  %v1854_v14 = vmul.f32 -1.442695, %v2771_v50 }
 0x103   : > { %v2216_v18 = vpop.eup %2215  ;;  %v1051_v19 = vadd.f32 1.0, %v2214_v17  ;;  %2235 = vpow2.f32 %v1853_v15  ;;  %v2063_v20 = vpop.f32.mrb[8].mxu0 }
 0x104   : > { %v2218_v21 = vpop.eup %2217  ;;  %v1083_v22 = vadd.f32 1.0, %v2216_v18  ;;  %2237 = vpow2.f32 %v1824_v16  ;;  %v2095_v23 = vpop.f32.mrb[8].mxu1  ;;  %v2775_v53 = vadd.f32 %v2063_v20, %v2708_v38 }
 0x105   : > { %v634_v24 = vpop.f32.mrb[9].mxu0  ;;  %v2220_v25 = vpop.eup %2219  ;;  %2239 = vrcp.f32 %v1051_v19  ;;  %v1049_v26 = vadd.f32 1.0, %v2218_v21  ;;  %v2778_v56 = vadd.f32 %v2095_v23, %v2708_v38 }
 0x106   : > { %v762_v27 = vpop.f32.mrb[9].mxu1  ;;  %v2064_v28 = vpop.f32.mrb[10].mxu0  ;;  %2241 = vrcp.f32 %v1083_v22  ;;  %v1081_v30 = vadd.f32 1.0, %v2220_v25  ;;  %v2784_v62 = vadd.f32 %v2708_v38, %v634_v24  ;;  %v1827_v20 = vmul.f32 -1.442695, %v2775_v53 }
 0x107   : > { %v2222_v29 = vpop.eup %2221  ;;  %v2096_v31 = vpop.f32.mrb[10].mxu1  ;;  %2243 = vrcp.f32 %v1049_v26  ;;  %v2792_v7 = vadd.f32 %v2708_v38, %v762_v27  ;;  %v2804_v15 = vadd.f32 %v2064_v28, %v2708_v38  ;;  %v1859_v21 = vmul.f32 -1.442695, %v2778_v56 }
 0x108   : > { %v637_v32 = vpop.f32.mrb[11].mxu0  ;;  %v2224_v33 = vpop.eup %2223  ;;  %v1052_v34 = vadd.f32 1.0, %v2222_v29  ;;  %2245 = vrcp.f32 %v1081_v30  ;;  %v1825_v25 = vmul.f32 -1.442695, %v2784_v62  ;;  %v2817_v26 = vadd.f32 %v2096_v31, %v2708_v38 }
 0x109   : > { %v2762_v35 = vpop.f32.mrb[11].mxu1  ;;  %v2226_v36 = vpop.eup %2225  ;;  %v1084_v37 = vadd.f32 1.0, %v2224_v33  ;;  %v1857_v29 = vmul.f32 -1.442695, %v2792_v7  ;;  %v2822_v30 = vadd.f32 %v2708_v38, %v637_v32 }
 0x10a   : > { %v2228_v41 = vpop.eup %2227  ;;  %2247 = vrcp.f32 %v1052_v34  ;;  %v1050_v42 = vadd.f32 1.0, %v2226_v36  ;;  %v1828_v36 = vmul.f32 -1.442695, %v2804_v15 }
 0x10b   : > { %v2230_v46 = vpop.eup %2229  ;;  %2249 = vrcp.f32 %v1084_v37  ;;  %v1082_v47 = vadd.f32 1.0, %v2228_v41  ;;  %v2780_v57 = vpop.f32.mrb[12].mxu0 }
 0x10c   : > { %v2232_v51 = vpop.eup %2231  ;;  %2251 = vrcp.f32 %v1050_v42  ;;  %v1055_v52 = vadd.f32 1.0, %v2230_v46  ;;  %v2786_v63 = vpop.f32.mrb[12].mxu1 }
 0x10d   : > { %v2234_v58 = vpop.eup %2233  ;;  %2253 = vrcp.f32 %v1082_v47  ;;  %v1087_v60 = vadd.f32 1.0, %v2232_v51  ;;  %v2788_v1 = vpop.f32.mrb[13].mxu0 }
 0x10e   : > { %v2236_v2 = vpop.eup %2235  ;;  %2255 = vrcp.f32 %v1055_v52  ;;  %v1053_v5 = vadd.f32 1.0, %v2234_v58  ;;  %v2794_v10 = vpop.f32.mrb[13].mxu1 }
 0x10f   : > { %v2796_v11 = vpop.f32.mrb[14].mxu0  ;;  %v2238_v12 = vpop.eup %2237  ;;  %2257 = vrcp.f32 %v1087_v60  ;;  %v1085_v13 = vadd.f32 1.0, %v2236_v2  ;;  %v2849_v60 = vadd.f32 %v2780_v57, %v2708_v38 }
 0x110   : > { %v2806_v16 = vpop.f32.mrb[14].mxu1  ;;  %v2808_v17 = vpop.f32.mrb[15].mxu0  ;;  %2259 = vrcp.f32 %v1053_v5  ;;  %v1056_v19 = vadd.f32 1.0, %v2238_v12 }
 0x111   : > { %v2240_v18 = vpop.eup %2239  ;;  %v2812_v22 = vpop.f32.mrb[15].mxu1  ;;  %2261 = vrcp.f32 %v1085_v13 }
 0x112   : > { %v2242_v23 = vpop.eup %2241  ;;  %v1243_v24 = vmul.f32 %v2240_v18, %v2711_v40  ;;  %2263 = vrcp.f32 %v1056_v19 }
 0x113   : > { %v2244_v27 = vpop.eup %2243  ;;  %v1275_v28 = vmul.f32 %v2242_v23, %v2714_v43  ;;  %2265 = vpow2.f32 %v1856_v61  ;;  %v2829_v43 = vadd.f32 %v2708_v38, %v2762_v35  ;;  %v2831_v42 = vpop.f32.mrb[16].mxu0 }
 0x114   : > { %v2246_v33 = vpop.eup %2245  ;;  %v1952_v34 = vpack.c.bf16 %v1243_v24, %v1243_v24  ;;  %v1241_v40 = vmul.f32 %v2244_v27, %v2717_v44  ;;  %2267 = vpow2.f32 %v1822_v6  ;;  %v2840_v47 = vpop.f32.mrb[16].mxu1  ;;  %v1831_v27 = vmul.f32 -1.442695, %v2849_v60 }
 0x115   : > { %v2248_v37 = vpop.eup %2247  ;;  %v1984_v31 = vpack.c.bf16 %v1275_v28, %v1275_v28  ;;  %v1273_v41 = vmul.f32 %v2246_v33, %v2721_v48  ;;  %2269 = vpow2.f32 %v1854_v14  ;;  %v1860_v48 = vmul.f32 -1.442695, %v2817_v26  ;;  %v2842_v35 = vpop.f32.mrb[17].mxu0 }
 0x116   : > { %v2250_v32 = vpop.eup %2249  ;;  %1564 = vst.msk [vmem:[%s2834_s18 + $0x8] sm:$0xf] %vm1561_vm3, %v1952_v34  ;;  %v1950_v44 = vpack.c.bf16 %v1241_v40, %v1241_v40  ;;  %v1244_v46 = vmul.f32 %v2248_v37, %v2724_v49  ;;  %2271 = vpow2.f32 %v1827_v20  ;;  %v2851_v49 = vpop.f32.mrb[17].mxu1  ;;  %v1858_v23 = vmul.f32 -1.442695, %v2829_v43 }
 0x117   : > { %v2252_v51 = vpop.eup %2251  ;;  %1596 = vst.msk [vmem:[%s2834_s18 + $0x88] sm:$0xf] %vm1561_vm3, %v1984_v31  ;;  %v1982_v52 = vpack.c.bf16 %v1273_v41, %v1273_v41  ;;  %v1276_v58 = vmul.f32 %v2250_v32, %v2729_v54  ;;  %v2853_v61 = vpop.f32.mrb[18].mxu0  ;;  %2273 = vpow2.f32 %v1859_v21  ;;  %v2860_v54 = vadd.f32 %v2786_v63, %v2708_v38 }
 0x118   : > { %v2254_v2 = vpop.eup %2253  ;;  %1562 = vst.msk [vmem:[%s2834_s18] sm:$0xf] %vm1561_vm3, %v1950_v44  ;;  %v1953_v5 = vpack.c.bf16 %v1244_v46, %v1244_v46  ;;  %v1242_v6 = vmul.f32 %v2252_v51, %v2732_v55  ;;  %v2862_v12 = vpop.f32.mrb[18].mxu1  ;;  %2275 = vpow2.f32 %v1825_v25  ;;  %v1826_v55 = vmul.f32 -1.442695, %v2822_v30 }
 0x119   : > { %v2864_v57 = vpop.f32.mrb[19].mxu0  ;;  %v2256_v13 = vpop.eup %2255  ;;  %1594 = vst.msk [vmem:[%s2834_s18 + $0x80] sm:$0xf] %vm1561_vm3, %v1982_v52  ;;  %v1985_v14 = vpack.c.bf16 %v1276_v58, %v1276_v58  ;;  %v1274_v18 = vmul.f32 %v2254_v2, %v2737_v59  ;;  %2277 = vpow2.f32 %v1857_v29  ;;  %v1863_v29 = vmul.f32 -1.442695, %v2860_v54 }
 0x11a   : > { %v2870_v19 = vpop.f32.mrb[19].mxu1  ;;  %v2258_v20 = vpop.eup %2257  ;;  %1565 = vst.msk [vmem:[%s2834_s18 + $0xc] sm:$0xf] %vm1561_vm3, %v1953_v5  ;;  %v1951_v63 = vpack.c.bf16 %v1242_v6, %v1242_v6  ;;  %v1247_v21 = vmul.f32 %v2256_v13, %v2743_v0  ;;  %2279 = vpow2.f32 %v1828_v36 }
 0x11b   : > { %v2260_v24 = vpop.eup %2259  ;;  %1597 = vst.msk [vmem:[%s2834_s18 + $0x8c] sm:$0xf] %vm1561_vm3, %v1985_v14  ;;  %v1983_v59 = vpack.c.bf16 %v1274_v18, %v1274_v18  ;;  %v1279_v25 = vmul.f32 %v2258_v20, %v2746_v3  ;;  %2281 = vpow2.f32 %v1860_v48  ;;  %v2887_v36 = vpop.f32.mrb[20].mxu0  ;;  %v2916_v20 = vadd.f32 %v2708_v38, %v2788_v1 }
 0x11c   : > { %v2262_v28 = vpop.eup %2261  ;;  %1563 = vst.msk [vmem:[%s2834_s18 + $0x4] sm:$0xf] %vm1561_vm3, %v1951_v63  ;;  %v1956_v33 = vpack.c.bf16 %v1247_v21, %v1247_v21  ;;  %v1245_v0 = vmul.f32 %v2260_v24, %v2749_v4  ;;  %2283 = vpow2.f32 %v1826_v55  ;;  %v2892_v41 = vpop.f32.mrb[20].mxu1  ;;  %v2923_v1 = vadd.f32 %v2708_v38, %v2794_v10 }
 0x11d   : > { %v2264_v34 = vpop.eup %2263  ;;  %1595 = vst.msk [vmem:[%s2834_s18 + $0x84] sm:$0xf] %vm1561_vm3, %v1983_v59  ;;  %v1988_v40 = vpack.c.bf16 %v1279_v25, %v1279_v25  ;;  %v1277_v3 = vmul.f32 %v2262_v28, %v2753_v8  ;;  %2285 = vpow2.f32 %v1858_v23  ;;  %v2894_v32 = vpop.f32.mrb[21].mxu0 }
 0x11e   : > { %v2266_v37 = vpop.eup %2265  ;;  %1568 = vst.msk [vmem:[%s2834_s18 + $0x18] sm:$0xf] %vm1561_vm3, %v1956_v33  ;;  %v1954_v31 = vpack.c.bf16 %v1245_v0, %v1245_v0  ;;  %v1248_v4 = vmul.f32 %v2264_v34, %v2756_v9  ;;  %2287 = vpow2.f32 %v1831_v27  ;;  %v2898_v48 = vpop.f32.mrb[21].mxu1  ;;  %v1829_v0 = vmul.f32 -1.442695, %v2916_v20 }
 0x11f   : > { %v2268_v44 = vpop.eup %2267  ;;  %1600 = vst.msk [vmem:[%s2834_s18 + $0x98] sm:$0xf] %vm1561_vm3, %v1988_v40  ;;  %v1986_v8 = vpack.c.bf16 %v1277_v3, %v1277_v3  ;;  %v1088_v46 = vadd.f32 1.0, %v2266_v37  ;;  %v2900_v51 = vpop.f32.mrb[22].mxu0  ;;  %2289 = vpow2.f32 %v1863_v29  ;;  %v2931_v37 = vadd.f32 %v2796_v11, %v2708_v38 }
 0x120   : > { %v2270_v52 = vpop.eup %2269  ;;  %1566 = vst.msk [vmem:[%s2834_s18 + $0x10] sm:$0xf] %vm1561_vm3, %v1954_v31  ;;  %v1957_v9 = vpack.c.bf16 %v1248_v4, %v1248_v4  ;;  %v1054_v58 = vadd.f32 1.0, %v2268_v44  ;;  %v2904_v2 = vpop.f32.mrb[22].mxu1  ;;  %v2935_v31 = vadd.f32 %v2806_v16, %v2708_v38 }
 0x121   : > { %v2906_v5 = vpop.f32.mrb[23].mxu0  ;;  %v2272_v6 = vpop.eup %2271  ;;  %1598 = vst.msk [vmem:[%s2834_s18 + $0x90] sm:$0xf] %vm1561_vm3, %v1986_v8  ;;  %2291 = vrcp.f32 %v1088_v46  ;;  %v1086_v13 = vadd.f32 1.0, %v2270_v52  ;;  %v2943_v46 = vadd.f32 %v2708_v38, %v2808_v17  ;;  %v2947_v52 = vadd.f32 %v2708_v38, %v2812_v22 }
 0x122   : > { %v2910_v14 = vpop.f32.mrb[23].mxu1  ;;  %v2274_v18 = vpop.eup %2273  ;;  %1569 = vst.msk [vmem:[%s2834_s18 + $0x1c] sm:$0xf] %vm1561_vm3, %v1957_v9  ;;  %2293 = vrcp.f32 %v1054_v58  ;;  %v1059_v55 = vadd.f32 1.0, %v2272_v6  ;;  %v2955_v6 = vadd.f32 %v2831_v42, %v2708_v38  ;;  %v1832_v42 = vmul.f32 -1.442695, %v2931_v37 }
 0x123   : > { %v2276_v63 = vpop.eup %2275  ;;  %2295 = vrcp.f32 %v1086_v13  ;;  %v1091_v21 = vadd.f32 1.0, %v2274_v18  ;;  %v2918_v27 = vpop.f32.mrb[24].mxu0  ;;  %v2959_v13 = vadd.f32 %v2840_v47, %v2708_v38 }
 0x124   : > { %v2278_v23 = vpop.eup %2277  ;;  %2297 = vrcp.f32 %v1059_v55  ;;  %v1057_v24 = vadd.f32 1.0, %v2276_v63  ;;  %v2925_v29 = vpop.f32.mrb[24].mxu1  ;;  %v1861_v55 = vmul.f32 -1.442695, %v2923_v1  ;;  %v2966_v63 = vadd.f32 %v2708_v38, %v2842_v35 }
 0x125   : > { %v2280_v59 = vpop.eup %2279  ;;  %2299 = vrcp.f32 %v1091_v21  ;;  %v1089_v25 = vadd.f32 1.0, %v2278_v23  ;;  %v2927_v34 = vpop.f32.mrb[25].mxu0  ;;  %v1835_v35 = vmul.f32 -1.442695, %v2955_v6 }
 0x126   : > { %v2282_v28 = vpop.eup %2281  ;;  %2301 = vrcp.f32 %v1057_v24  ;;  %v1060_v33 = vadd.f32 1.0, %v2280_v59  ;;  %v2937_v4 = vpop.f32.mrb[25].mxu1  ;;  %v1864_v24 = vmul.f32 -1.442695, %v2935_v31 }
 0x127   : > { %v2284_v40 = vpop.eup %2283  ;;  %2303 = vrcp.f32 %v1089_v25  ;;  %v1092_v3 = vadd.f32 1.0, %v2282_v28  ;;  %v2939_v44 = vpop.f32.mrb[26].mxu0  ;;  %v1830_v25 = vmul.f32 -1.442695, %v2943_v46  ;;  %v1862_v28 = vmul.f32 -1.442695, %v2947_v52 }
 0x128   : > { %v2286_v10 = vpop.eup %2285  ;;  %2305 = vrcp.f32 %v1060_v33  ;;  %v1058_v8 = vadd.f32 1.0, %v2284_v40  ;;  %v2949_v11 = vpop.f32.mrb[26].mxu1 }
 0x129   : > { %v2951_v9 = vpop.f32.mrb[27].mxu0  ;;  %v2288_v16 = vpop.eup %2287  ;;  %2307 = vrcp.f32 %v1092_v3  ;;  %v1090_v58 = vadd.f32 1.0, %v2286_v10  ;;  %v1867_v3 = vmul.f32 -1.442695, %v2959_v13 }
 0x12a   : > { %v2961_v17 = vpop.f32.mrb[27].mxu1  ;;  %v2290_v18 = vpop.eup %2289  ;;  %2309 = vrcp.f32 %v1058_v8  ;;  %v1063_v22 = vadd.f32 1.0, %v2288_v16 }
 0x12b   : > { %v2292_v21 = vpop.eup %2291  ;;  %2311 = vrcp.f32 %v1090_v58  ;;  %v1095_v23 = vadd.f32 1.0, %v2290_v18  ;;  %v2976_v10 = vpop.f32.mrb[28].mxu0  ;;  %v1833_v58 = vmul.f32 -1.442695, %v2966_v63 }
 0x12c   : > { %v2294_v47 = vpop.eup %2293  ;;  %v1280_v59 = vmul.f32 %v2292_v21, %v2765_v39  ;;  %2313 = vrcp.f32 %v1063_v22  ;;  %v2980_v18 = vpop.f32.mrb[28].mxu1 }
 0x12d   : > { %v2296_v33 = vpop.eup %2295  ;;  %v1246_v40 = vmul.f32 %v2294_v47, %v2768_v45  ;;  %2315 = vrcp.f32 %v1095_v23  ;;  %v2982_v22 = vpop.f32.mrb[29].mxu0  ;;  %v2987_v47 = vadd.f32 %v2708_v38, %v2851_v49 }
 0x12e   : > { %v2298_v8 = vpop.eup %2297  ;;  %v1989_v16 = vpack.c.bf16 %v1280_v59, %v1280_v59  ;;  %v1278_v39 = vmul.f32 %v2296_v33, %v2771_v50  ;;  %2317 = vpow2.f32 %v1829_v0  ;;  %3343 = vst [vmem:[#allocation5_spill] sm:$0xff] %v2982_v22  ;;  %v2989_v59 = vpop.f32.mrb[29].mxu1 }
 0x12f   : > { %v2300_v45 = vpop.eup %2299  ;;  %v1955_v21 = vpack.c.bf16 %v1246_v40, %v1246_v40  ;;  %v1251_v23 = vmul.f32 %v2298_v8, %v2775_v53  ;;  %2319 = vpow2.f32 %v1861_v55  ;;  %v2991_v50 = vpop.f32.mrb[30].mxu0  ;;  %v2998_v53 = vadd.f32 %v2853_v61, %v2708_v38 }
 0x130   : > { %3344 = vst [vmem:[#allocation6_spill] sm:$0xff] %v2991_v50  ;;  %v2302_v0 = vpop.eup %2301  ;;  %1601 = vst.msk [vmem:[%s2834_s18 + $0x9c] sm:$0xf] %vm1561_vm3, %v1989_v16  ;;  %v1987_v33 = vpack.c.bf16 %v1278_v39, %v1278_v39  ;;  %v1283_v22 = vmul.f32 %v2300_v45, %v2778_v56  ;;  %2321 = vpow2.f32 %v1832_v42  ;;  %v3000_v55 = vpop.f32.mrb[30].mxu1  ;;  %v3009_v56 = vadd.f32 %v2862_v12, %v2708_v38 }
 0x131   : > { %v3002_v49 = vpop.f32.mrb[31].mxu0  ;;  %v2304_v40 = vpop.eup %2303  ;;  %1567 = vst.msk [vmem:[%s2834_s18 + $0x14] sm:$0xf] %vm1561_vm3, %v1955_v21  ;;  %v1960_v8 = vpack.c.bf16 %v1251_v23, %v1251_v23  ;;  %v1249_v50 = vmul.f32 %v2302_v0, %v2784_v62  ;;  %2323 = vpow2.f32 %v1864_v24  ;;  %v3018_v45 = vadd.f32 %v2708_v38, %v2864_v57 }
 0x132   : > { %v3011_v42 = vpop.f32.mrb[31].mxu1  ;;  %v2306_v61 = vpop.eup %2305  ;;  %1599 = vst.msk [vmem:[%s2834_s18 + $0x94] sm:$0xf] %vm1561_vm3, %v1987_v33  ;;  %v1992_v16 = vpack.c.bf16 %v1283_v22, %v1283_v22  ;;  %v1281_v39 = vmul.f32 %v2304_v40, %v2792_v7  ;;  %2325 = vpow2.f32 %v1830_v25  ;;  %v1865_v21 = vmul.f32 -1.442695, %v2987_v47 }
 0x133   : > { %v2308_v62 = vpop.eup %2307  ;;  %1572 = vst.msk [vmem:[%s2834_s18 + $0x28] sm:$0xf] %vm1561_vm3, %v1960_v8  ;;  %v1958_v24 = vpack.c.bf16 %v1249_v50, %v1249_v50  ;;  %v1252_v12 = vmul.f32 %v2306_v61, %v2804_v15  ;;  %2327 = vpow2.f32 %v1862_v28  ;;  %v1836_v57 = vmul.f32 -1.442695, %v2998_v53 }
 0x134   : > { %v2310_v23 = vpop.eup %2309  ;;  %1604 = vst.msk [vmem:[%s2834_s18 + $0xa8] sm:$0xf] %vm1561_vm3, %v1992_v16  ;;  %v1990_v7 = vpack.c.bf16 %v1281_v39, %v1281_v39  ;;  %v1284_v25 = vmul.f32 %v2308_v62, %v2817_v26  ;;  %2329 = vpow2.f32 %v1835_v35  ;;  %v1868_v28 = vmul.f32 -1.442695, %v3009_v56 }
 0x135   : > { %v2312_v22 = vpop.eup %2311  ;;  %1570 = vst.msk [vmem:[%s2834_s18 + $0x20] sm:$0xf] %vm1561_vm3, %v1958_v24  ;;  %v1961_v50 = vpack.c.bf16 %v1252_v12, %v1252_v12  ;;  %v1250_v15 = vmul.f32 %v2310_v23, %v2822_v30  ;;  %2331 = vpow2.f32 %v1867_v3  ;;  %v1834_v35 = vmul.f32 -1.442695, %v3018_v45 }
 0x136   : > { %v2314_v0 = vpop.eup %2313  ;;  %1602 = vst.msk [vmem:[%s2834_s18 + $0xa0] sm:$0xf] %vm1561_vm3, %v1990_v7  ;;  %v1993_v33 = vpack.c.bf16 %v1284_v25, %v1284_v25  ;;  %v1282_v26 = vmul.f32 %v2312_v22, %v2829_v43  ;;  %2333 = vpow2.f32 %v1833_v58 }
 0x137   : > { %v2316_v40 = vpop.eup %2315  ;;  %1573 = vst.msk [vmem:[%s2834_s18 + $0x2c] sm:$0xf] %vm1561_vm3, %v1961_v50  ;;  %v1959_v8 = vpack.c.bf16 %v1250_v15, %v1250_v15  ;;  %v1255_v30 = vmul.f32 %v2314_v0, %v2849_v60  ;;  %2335 = vpow2.f32 %v1865_v21 }
 0x138   : > { %v2318_v3 = vpop.eup %2317  ;;  %1605 = vst.msk [vmem:[%s2834_s18 + $0xac] sm:$0xf] %vm1561_vm3, %v1993_v33  ;;  %v1991_v61 = vpack.c.bf16 %v1282_v26, %v1282_v26  ;;  %v1287_v16 = vmul.f32 %v2316_v40, %v2860_v54  ;;  %2337 = vpow2.f32 %v1836_v57  ;;  %v3052_v57 = vadd.f32 %v2708_v38, %v2870_v19 }
 0x139   : > { %v2320_v43 = vpop.eup %2319  ;;  %1571 = vst.msk [vmem:[%s2834_s18 + $0x24] sm:$0xf] %vm1561_vm3, %v1959_v8  ;;  %v1964_v58 = vpack.c.bf16 %v1255_v30, %v1255_v30  ;;  %v1061_v39 = vadd.f32 1.0, %v2318_v3  ;;  %2339 = vpow2.f32 %v1868_v28  ;;  %v3056_v26 = vadd.f32 %v2887_v36, %v2708_v38 }
 0x13a   : > { %v2322_v62 = vpop.eup %2321  ;;  %1603 = vst.msk [vmem:[%s2834_s18 + $0xa4] sm:$0xf] %vm1561_vm3, %v1991_v61  ;;  %v1996_v60 = vpack.c.bf16 %v1287_v16, %v1287_v16  ;;  %v1093_v24 = vadd.f32 1.0, %v2320_v43  ;;  %2341 = vpow2.f32 %v1834_v35  ;;  %v3060_v35 = vadd.f32 %v2892_v41, %v2708_v38 }
 0x13b   : > { %v2324_v12 = vpop.eup %2323  ;;  %1576 = vst.msk [vmem:[%s2834_s18 + $0x38] sm:$0xf] %vm1561_vm3, %v1964_v58  ;;  %2343 = vrcp.f32 %v1061_v39  ;;  %v1064_v21 = vadd.f32 1.0, %v2322_v62  ;;  %v1866_v8 = vmul.f32 -1.442695, %v3052_v57  ;;  %v3065_v30 = vadd.f32 %v2708_v38, %v2894_v32 }
 0x13c   : > { %v2326_v54 = vpop.eup %2325  ;;  %1608 = vst.msk [vmem:[%s2834_s18 + $0xb8] sm:$0xf] %vm1561_vm3, %v1996_v60  ;;  %2345 = vrcp.f32 %v1093_v24  ;;  %v1096_v23 = vadd.f32 1.0, %v2324_v12  ;;  %v3069_v36 = vadd.f32 %v2708_v38, %v2898_v48  ;;  %v3073_v41 = vadd.f32 %v2900_v51, %v2708_v38 }
 0x13d   : > { %v2328_v7 = vpop.eup %2327  ;;  %2347 = vrcp.f32 %v1064_v21  ;;  %v1062_v25 = vadd.f32 1.0, %v2326_v54  ;;  %v3077_v58 = vadd.f32 %v2904_v2, %v2708_v38  ;;  %v3081_v32 = vadd.f32 %v2708_v38, %v2906_v5 }
 0x13e   : > { %v2330_v22 = vpop.eup %2329  ;;  %2349 = vrcp.f32 %v1096_v23  ;;  %v1094_v50 = vadd.f32 1.0, %v2328_v7  ;;  %v1839_v48 = vmul.f32 -1.442695, %v3056_v26  ;;  %v1871_v60 = vmul.f32 -1.442695, %v3060_v35 }
 0x13f   : > { %v2332_v15 = vpop.eup %2331  ;;  %2351 = vrcp.f32 %v1062_v25  ;;  %v1067_v28 = vadd.f32 1.0, %v2330_v22  ;;  %v1837_v12 = vmul.f32 -1.442695, %v3065_v30  ;;  %v3088_v2 = vadd.f32 %v2708_v38, %v2910_v14 }
 0x140   : > { %v2334_v0 = vpop.eup %2333  ;;  %2353 = vrcp.f32 %v1094_v50  ;;  %v1099_v33 = vadd.f32 1.0, %v2332_v15  ;;  %v1869_v54 = vmul.f32 -1.442695, %v3069_v36  ;;  %v1840_v23 = vmul.f32 -1.442695, %v3073_v41 }
 0x141   : > { %v2336_v40 = vpop.eup %2335  ;;  %2355 = vrcp.f32 %v1067_v28  ;;  %v1065_v19 = vadd.f32 1.0, %v2334_v0  ;;  %v1872_v22 = vmul.f32 -1.442695, %v3077_v58  ;;  %v1838_v50 = vmul.f32 -1.442695, %v3081_v32 }
 0x142   : > { %v2338_v3 = vpop.eup %2337  ;;  %2357 = vrcp.f32 %v1099_v33  ;;  %v1097_v61 = vadd.f32 1.0, %v2336_v40 }
 0x143   : > { %v2340_v16 = vpop.eup %2339  ;;  %2359 = vrcp.f32 %v1065_v19  ;;  %v1068_v43 = vadd.f32 1.0, %v2338_v3 }
 0x144   : > { %v2342_v39 = vpop.eup %2341  ;;  %2361 = vrcp.f32 %v1097_v61  ;;  %v1100_v62 = vadd.f32 1.0, %v2340_v16  ;;  %v3115_v16 = vadd.f32 %v2708_v38, %v2927_v34 }
 0x145   : > { %v2344_v51 = vpop.eup %2343  ;;  %2363 = vrcp.f32 %v1068_v43  ;;  %v1066_v24 = vadd.f32 1.0, %v2342_v39 }
 0x146   : > { %v2346_v21 = vpop.eup %2345  ;;  %v1253_v5 = vmul.f32 %v2344_v51, %v2916_v20  ;;  %2365 = vrcp.f32 %v1100_v62  ;;  %v3099_v20 = vadd.f32 %v2918_v27, %v2708_v38  ;;  %v3108_v27 = vadd.f32 %v2925_v29, %v2708_v38 }
 0x147   : > { %v2348_v7 = vpop.eup %2347  ;;  %v1285_v25 = vmul.f32 %v2346_v21, %v2923_v1  ;;  %2367 = vrcp.f32 %v1066_v24  ;;  %v1870_v1 = vmul.f32 -1.442695, %v3088_v2  ;;  %v3122_v29 = vadd.f32 %v2708_v38, %v2937_v4 }
 0x148   : > { %v2350_v15 = vpop.eup %2349  ;;  %v1962_v14 = vpack.c.bf16 %v1253_v5, %v1253_v5  ;;  %v1256_v28 = vmul.f32 %v2348_v7, %v2931_v37  ;;  %2369 = vpow2.f32 %v1866_v8  ;;  %v1843_v34 = vmul.f32 -1.442695, %v3099_v20 }
 0x149   : > { %v2352_v0 = vpop.eup %2351  ;;  %v1994_v33 = vpack.c.bf16 %v1285_v25, %v1285_v25  ;;  %v1288_v40 = vmul.f32 %v2350_v15, %v2935_v31  ;;  %2371 = vpow2.f32 %v1839_v48  ;;  %v1875_v38 = vmul.f32 -1.442695, %v3108_v27 }
 0x14a   : > { %v2354_v19 = vpop.eup %2353  ;;  %1574 = vst.msk [vmem:[%s2834_s18 + $0x30] sm:$0xf] %vm1561_vm3, %v1962_v14  ;;  %v1965_v3 = vpack.c.bf16 %v1256_v28, %v1256_v28  ;;  %v1254_v61 = vmul.f32 %v2352_v0, %v2943_v46  ;;  %2373 = vpow2.f32 %v1871_v60 }
 0x14b   : > { %v2356_v37 = vpop.eup %2355  ;;  %1606 = vst.msk [vmem:[%s2834_s18 + $0xb0] sm:$0xf] %vm1561_vm3, %v1994_v33  ;;  %v1997_v31 = vpack.c.bf16 %v1288_v40, %v1288_v40  ;;  %v1286_v8 = vmul.f32 %v2354_v19, %v2947_v52  ;;  %2375 = vpow2.f32 %v1837_v12  ;;  %v1841_v12 = vmul.f32 -1.442695, %v3115_v16 }
 0x14c   : > { %v2358_v43 = vpop.eup %2357  ;;  %1577 = vst.msk [vmem:[%s2834_s18 + $0x3c] sm:$0xf] %vm1561_vm3, %v1965_v3  ;;  %v1963_v46 = vpack.c.bf16 %v1254_v61, %v1254_v61  ;;  %v1259_v39 = vmul.f32 %v2356_v37, %v2955_v6  ;;  %2377 = vpow2.f32 %v1869_v54  ;;  %v1873_v54 = vmul.f32 -1.442695, %v3122_v29 }
 0x14d   : > { %v2360_v62 = vpop.eup %2359  ;;  %1609 = vst.msk [vmem:[%s2834_s18 + $0xbc] sm:$0xf] %vm1561_vm3, %v1997_v31  ;;  %v1995_v52 = vpack.c.bf16 %v1286_v8, %v1286_v8  ;;  %v1291_v48 = vmul.f32 %v2358_v43, %v2959_v13  ;;  %2379 = vpow2.f32 %v1840_v23 }
 0x14e   : > { %v2362_v60 = vpop.eup %2361  ;;  %1575 = vst.msk [vmem:[%s2834_s18 + $0x34] sm:$0xf] %vm1561_vm3, %v1963_v46  ;;  %v1968_v6 = vpack.c.bf16 %v1259_v39, %v1259_v39  ;;  %v1257_v51 = vmul.f32 %v2360_v62, %v2966_v63  ;;  %2381 = vpow2.f32 %v1872_v22  ;;  %v2469_v39 = vld [vmem:[%s3339_s2] ss:$0 sm:$0xff] }
 0x14f   : > { %v2364_v4 = vpop.eup %2363  ;;  %1607 = vst.msk [vmem:[%s2834_s18 + $0xb4] sm:$0xf] %vm1561_vm3, %v1995_v52  ;;  %v2000_v24 = vpack.c.bf16 %v1291_v48, %v1291_v48  ;;  %v1289_v13 = vmul.f32 %v2362_v60, %v2987_v47  ;;  %2383 = vpow2.f32 %v1838_v50  ;;  %v3158_v62 = vadd.f32 %v2469_v39, %v2939_v44 }
 0x150   : > { %v2366_v21 = vpop.eup %2365  ;;  %1580 = vst.msk [vmem:[%s2834_s18 + $0x48] sm:$0xf] %vm1561_vm3, %v1968_v6  ;;  %v1966_v5 = vpack.c.bf16 %v1257_v51, %v1257_v51  ;;  %v1260_v63 = vmul.f32 %v2364_v4, %v2998_v53  ;;  %2385 = vpow2.f32 %v1870_v1  ;;  %v3161_v52 = vadd.f32 %v2469_v39, %v2949_v11 }
 0x151   : > { %v2368_v23 = vpop.eup %2367  ;;  %1612 = vst.msk [vmem:[%s2834_s18 + $0xc8] sm:$0xf] %vm1561_vm3, %v2000_v24  ;;  %v1998_v7 = vpack.c.bf16 %v1289_v13, %v1289_v13  ;;  %v1292_v47 = vmul.f32 %v2366_v21, %v3009_v56  ;;  %2387 = vpow2.f32 %v1843_v34  ;;  %v3164_v60 = vadd.f32 %v2469_v39, %v2951_v9  ;;  %v3345_v13 = vld [vmem:[#allocation5_spill] sm:$0xff] }
 0x152   : > { %v2370_v25 = vpop.eup %2369  ;;  %1578 = vst.msk [vmem:[%s2834_s18 + $0x40] sm:$0xf] %vm1561_vm3, %v1966_v5  ;;  %v1969_v22 = vpack.c.bf16 %v1260_v63, %v1260_v63  ;;  %v1258_v50 = vmul.f32 %v2368_v23, %v3018_v45  ;;  %2389 = vpow2.f32 %v1875_v38  ;;  %v3167_v6 = vadd.f32 %v2469_v39, %v2961_v17 }
 0x153   : > { %v2372_v53 = vpop.eup %2371  ;;  %1610 = vst.msk [vmem:[%s2834_s18 + $0xc0] sm:$0xf] %vm1561_vm3, %v1998_v7  ;;  %v2001_v15 = vpack.c.bf16 %v1292_v47, %v1292_v47  ;;  %v1098_v14 = vadd.f32 1.0, %v2370_v25  ;;  %2391 = vpow2.f32 %v1841_v12  ;;  %v3170_v4 = vadd.f32 %v2469_v39, %v2976_v10 }
 0x154   : > { %v2374_v28 = vpop.eup %2373  ;;  %1581 = vst.msk [vmem:[%s2834_s18 + $0x4c] sm:$0xf] %vm1561_vm3, %v1969_v22  ;;  %v1967_v56 = vpack.c.bf16 %v1258_v50, %v1258_v50  ;;  %v1071_v0 = vadd.f32 1.0, %v2372_v53  ;;  %2393 = vpow2.f32 %v1873_v54  ;;  %v3173_v44 = vadd.f32 %v2469_v39, %v2980_v18 }
 0x155   : > { %v2376_v33 = vpop.eup %2375  ;;  %1613 = vst.msk [vmem:[%s2834_s18 + $0xcc] sm:$0xf] %vm1561_vm3, %v2001_v15  ;;  %2395 = vrcp.f32 %v1098_v14  ;;  %v1103_v40 = vadd.f32 1.0, %v2374_v28  ;;  %v3176_v12 = vadd.f32 %v2469_v39, %v3345_v13  ;;  %v3179_v9 = vadd.f32 %v2469_v39, %v2989_v59 }
 0x156   : > { %v2378_v45 = vpop.eup %2377  ;;  %1579 = vst.msk [vmem:[%s2834_s18 + $0x44] sm:$0xf] %vm1561_vm3, %v1967_v56  ;;  %2397 = vrcp.f32 %v1071_v0  ;;  %v1069_v1 = vadd.f32 1.0, %v2376_v33  ;;  %v1844_v5 = vmul.f32 -1.442695, %v3158_v62 }
 0x157   : > { %v2380_v19 = vpop.eup %2379  ;;  %2399 = vrcp.f32 %v1103_v40  ;;  %v1101_v3 = vadd.f32 1.0, %v2378_v45  ;;  %v1876_v10 = vmul.f32 -1.442695, %v3161_v52  ;;  %v1842_v54 = vmul.f32 -1.442695, %v3164_v60 }
 0x158   : > { %v2382_v61 = vpop.eup %2381  ;;  %2401 = vrcp.f32 %v1069_v1  ;;  %v1072_v37 = vadd.f32 1.0, %v2380_v19  ;;  %v1874_v23 = vmul.f32 -1.442695, %v3167_v6  ;;  %v1847_v59 = vmul.f32 -1.442695, %v3170_v4 }
 0x159   : > { %v2384_v31 = vpop.eup %2383  ;;  %2403 = vrcp.f32 %v1101_v3  ;;  %v1104_v8 = vadd.f32 1.0, %v2382_v61  ;;  %v1879_v25 = vmul.f32 -1.442695, %v3173_v44  ;;  %v1845_v53 = vmul.f32 -1.442695, %v3176_v12 }
 0x15a   : > { %v2386_v43 = vpop.eup %2385  ;;  %2405 = vrcp.f32 %v1072_v37  ;;  %v1070_v46 = vadd.f32 1.0, %v2384_v31  ;;  %v1877_v15 = vmul.f32 -1.442695, %v3179_v9 }
 0x15b   : > { %v2388_v48 = vpop.eup %2387  ;;  %2407 = vrcp.f32 %v1104_v8  ;;  %v1102_v34 = vadd.f32 1.0, %v2386_v43 }
 0x15c   : > { %v2390_v51 = vpop.eup %2389  ;;  %2409 = vrcp.f32 %v1070_v46  ;;  %v1075_v38 = vadd.f32 1.0, %v2388_v48 }
 0x15d   : > { %v2392_v11 = vpop.eup %2391  ;;  %2411 = vrcp.f32 %v1102_v34  ;;  %v1107_v24 = vadd.f32 1.0, %v2390_v51 }
 0x15e   : > { %v2394_v17 = vpop.eup %2393  ;;  %2413 = vrcp.f32 %v1075_v38  ;;  %v1073_v21 = vadd.f32 1.0, %v2392_v11 }
 0x15f   : > { %v2396_v63 = vpop.eup %2395  ;;  %2415 = vrcp.f32 %v1107_v24  ;;  %v1105_v18 = vadd.f32 1.0, %v2394_v17 }
 0x160   : > { %v2398_v7 = vpop.eup %2397  ;;  %v1290_v47 = vmul.f32 %v2396_v63, %v3052_v57  ;;  %2417 = vrcp.f32 %v1073_v21  ;;  %v3346_v57 = vld [vmem:[#allocation6_spill] sm:$0xff] }
 0x161   : > { %v2400_v22 = vpop.eup %2399  ;;  %v1263_v50 = vmul.f32 %v2398_v7, %v3056_v26  ;;  %2419 = vrcp.f32 %v1105_v18  ;;  %v3193_v0 = vadd.f32 %v2469_v39, %v3346_v57  ;;  %v3197_v26 = vadd.f32 %v2469_v39, %v3000_v55 }
 0x162   : > { %v2402_v14 = vpop.eup %2401  ;;  %v1999_v28 = vpack.c.bf16 %v1290_v47, %v1290_v47  ;;  %v1295_v56 = vmul.f32 %v2400_v22, %v3060_v35  ;;  %2421 = vpow2.f32 %v1844_v5  ;;  %v3203_v35 = vadd.f32 %v2469_v39, %v3002_v49 }
 0x163   : > { %v2404_v33 = vpop.eup %2403  ;;  %v1972_v40 = vpack.c.bf16 %v1263_v50, %v1263_v50  ;;  %v1261_v45 = vmul.f32 %v2402_v14, %v3065_v30  ;;  %2423 = vpow2.f32 %v1876_v10  ;;  %v3209_v55 = vadd.f32 %v2469_v39, %v3011_v42 }
 0x164   : > { %v2406_v1 = vpop.eup %2405  ;;  %1611 = vst.msk [vmem:[%s2834_s18 + $0xc4] sm:$0xf] %vm1561_vm3, %v1999_v28  ;;  %v2004_v19 = vpack.c.bf16 %v1295_v56, %v1295_v56  ;;  %v1293_v3 = vmul.f32 %v2404_v33, %v3069_v36  ;;  %2425 = vpow2.f32 %v1842_v54  ;;  %v1848_v49 = vmul.f32 -1.442695, %v3193_v0 }
 0x165   : > { %v2408_v61 = vpop.eup %2407  ;;  %1584 = vst.msk [vmem:[%s2834_s18 + $0x58] sm:$0xf] %vm1561_vm3, %v1972_v40  ;;  %v1970_v30 = vpack.c.bf16 %v1261_v45, %v1261_v45  ;;  %v1264_v37 = vmul.f32 %v2406_v1, %v3073_v41  ;;  %2427 = vpow2.f32 %v1874_v23  ;;  %v1880_v42 = vmul.f32 -1.442695, %v3197_v26 }
 0x166   : > { %v2410_v31 = vpop.eup %2409  ;;  %1616 = vst.msk [vmem:[%s2834_s18 + $0xd8] sm:$0xf] %vm1561_vm3, %v2004_v19  ;;  %v2002_v36 = vpack.c.bf16 %v1293_v3, %v1293_v3  ;;  %v1296_v8 = vmul.f32 %v2408_v61, %v3077_v58  ;;  %2429 = vpow2.f32 %v1847_v59  ;;  %v1846_v34 = vmul.f32 -1.442695, %v3203_v35 }
 0x167   : > { %v2412_v43 = vpop.eup %2411  ;;  %1582 = vst.msk [vmem:[%s2834_s18 + $0x50] sm:$0xf] %vm1561_vm3, %v1970_v30  ;;  %v1973_v46 = vpack.c.bf16 %v1264_v37, %v1264_v37  ;;  %v1262_v41 = vmul.f32 %v2410_v31, %v3081_v32  ;;  %2431 = vpow2.f32 %v1879_v25  ;;  %v1878_v11 = vmul.f32 -1.442695, %v3209_v55 }
 0x168   : > { %v2414_v39 = vpop.eup %2413  ;;  %1614 = vst.msk [vmem:[%s2834_s18 + $0xd0] sm:$0xf] %vm1561_vm3, %v2002_v36  ;;  %v2005_v48 = vpack.c.bf16 %v1296_v8, %v1296_v8  ;;  %v1294_v58 = vmul.f32 %v2412_v43, %v3088_v2  ;;  %2433 = vpow2.f32 %v1845_v53 }
 0x169   : > { %v2416_v51 = vpop.eup %2415  ;;  %1585 = vst.msk [vmem:[%s2834_s18 + $0x5c] sm:$0xf] %vm1561_vm3, %v1973_v46  ;;  %v1971_v38 = vpack.c.bf16 %v1262_v41, %v1262_v41  ;;  %v1267_v32 = vmul.f32 %v2414_v39, %v3099_v20  ;;  %2435 = vpow2.f32 %v1877_v15 }
 0x16a   : > { %v2418_v24 = vpop.eup %2417  ;;  %1617 = vst.msk [vmem:[%s2834_s18 + $0xdc] sm:$0xf] %vm1561_vm3, %v2005_v48  ;;  %v2003_v13 = vpack.c.bf16 %v1294_v58, %v1294_v58  ;;  %v1299_v2 = vmul.f32 %v2416_v51, %v3108_v27  ;;  %2437 = vpow2.f32 %v1848_v49 }
 0x16b   : > { %v2420_v17 = vpop.eup %2419  ;;  %1583 = vst.msk [vmem:[%s2834_s18 + $0x54] sm:$0xf] %vm1561_vm3, %v1971_v38  ;;  %v1976_v21 = vpack.c.bf16 %v1267_v32, %v1267_v32  ;;  %v1265_v5 = vmul.f32 %v2418_v24, %v3115_v16  ;;  %2439 = vpow2.f32 %v1880_v42 }
 0x16c   : > { %v2422_v20 = vpop.eup %2421  ;;  %1615 = vst.msk [vmem:[%s2834_s18 + $0xd4] sm:$0xf] %vm1561_vm3, %v2003_v13  ;;  %v2008_v10 = vpack.c.bf16 %v1299_v2, %v1299_v2  ;;  %v1297_v63 = vmul.f32 %v2420_v17, %v3122_v29  ;;  %2441 = vpow2.f32 %v1846_v34 }
 0x16d   : > { %v2424_v18 = vpop.eup %2423  ;;  %1588 = vst.msk [vmem:[%s2834_s18 + $0x68] sm:$0xf] %vm1561_vm3, %v1976_v21  ;;  %v1974_v27 = vpack.c.bf16 %v1265_v5, %v1265_v5  ;;  %v1076_v54 = vadd.f32 1.0, %v2422_v20  ;;  %2443 = vpow2.f32 %v1878_v11 }
 0x16e   : > { %v2426_v23 = vpop.eup %2425  ;;  %1620 = vst.msk [vmem:[%s2834_s18 + $0xe8] sm:$0xf] %vm1561_vm3, %v2008_v10  ;;  %v2006_v16 = vpack.c.bf16 %v1297_v63, %v1297_v63  ;;  %v1108_v7 = vadd.f32 1.0, %v2424_v18 }
 0x16f   : > { %v2428_v47 = vpop.eup %2427  ;;  %1586 = vst.msk [vmem:[%s2834_s18 + $0x60] sm:$0xf] %vm1561_vm3, %v1974_v27  ;;  %2445 = vrcp.f32 %v1076_v54  ;;  %v1074_v59 = vadd.f32 1.0, %v2426_v23 }
 0x170   : > { %v2430_v25 = vpop.eup %2429  ;;  %1618 = vst.msk [vmem:[%s2834_s18 + $0xe0] sm:$0xf] %vm1561_vm3, %v2006_v16  ;;  %2447 = vrcp.f32 %v1108_v7  ;;  %v1106_v29 = vadd.f32 1.0, %v2428_v47 }
 0x171   : > { %v2432_v22 = vpop.eup %2431  ;;  %2449 = vrcp.f32 %v1074_v59  ;;  %v1079_v50 = vadd.f32 1.0, %v2430_v25 }
 0x172   : > { %v2434_v53 = vpop.eup %2433  ;;  %2451 = vrcp.f32 %v1106_v29  ;;  %v1111_v15 = vadd.f32 1.0, %v2432_v22 }
 0x173   : > { %v2436_v14 = vpop.eup %2435  ;;  %2453 = vrcp.f32 %v1079_v50  ;;  %v1077_v28 = vadd.f32 1.0, %v2434_v53 }
 0x174   : > { %v2438_v56 = vpop.eup %2437  ;;  %2455 = vrcp.f32 %v1111_v15  ;;  %v1109_v57 = vadd.f32 1.0, %v2436_v14 }
 0x175   : > { %v2440_v33 = vpop.eup %2439  ;;  %2457 = vrcp.f32 %v1077_v28  ;;  %v1080_v40 = vadd.f32 1.0, %v2438_v56 }
 0x176   : > { %v2442_v45 = vpop.eup %2441  ;;  %2459 = vrcp.f32 %v1109_v57  ;;  %v1112_v1 = vadd.f32 1.0, %v2440_v33 }
 0x177   : > { %v2444_v19 = vpop.eup %2443  ;;  %2461 = vrcp.f32 %v1080_v40  ;;  %v1078_v3 = vadd.f32 1.0, %v2442_v45 }
 0x178   : > { %2463 = vrcp.f32 %v1112_v1  ;;  %v1110_v61 = vadd.f32 1.0, %v2444_v19 }
 0x179   : > { %v2446_v30 = vpop.eup %2445  ;;  %2465 = vrcp.f32 %v1078_v3 }
 0x17a   : > { %v2448_v37 = vpop.eup %2447  ;;  %v1268_v31 = vmul.f32 %v2446_v30, %v3158_v62  ;;  %2467 = vrcp.f32 %v1110_v61 }
 0x17b   : > { %v2450_v36 = vpop.eup %2449  ;;  %v1300_v8 = vmul.f32 %v2448_v37, %v3161_v52 }
 0x17c   : > { %v2452_v49 = vpop.eup %2451  ;;  %v1977_v43 = vpack.c.bf16 %v1268_v31, %v1268_v31  ;;  %v1266_v46 = vmul.f32 %v2450_v36, %v3164_v60 }
 0x17d   : > { %v2454_v41 = vpop.eup %2453  ;;  %v2009_v42 = vpack.c.bf16 %v1300_v8, %v1300_v8  ;;  %v1298_v39 = vmul.f32 %v2452_v49, %v3167_v6 }
 0x17e   : > { %v2456_v48 = vpop.eup %2455  ;;  %1589 = vst.msk [vmem:[%s2834_s18 + $0x6c] sm:$0xf] %vm1561_vm3, %v1977_v43  ;;  %v1975_v58 = vpack.c.bf16 %v1266_v46, %v1266_v46  ;;  %v1271_v62 = vmul.f32 %v2454_v41, %v3170_v4 }
 0x17f   : > { %v2458_v34 = vpop.eup %2457  ;;  %1621 = vst.msk [vmem:[%s2834_s18 + $0xec] sm:$0xf] %vm1561_vm3, %v2009_v42  ;;  %v2007_v52 = vpack.c.bf16 %v1298_v39, %v1298_v39  ;;  %v1303_v60 = vmul.f32 %v2456_v48, %v3173_v44 }
 0x180   : > { %v2460_v51 = vpop.eup %2459  ;;  %1587 = vst.msk [vmem:[%s2834_s18 + $0x64] sm:$0xf] %vm1561_vm3, %v1975_v58  ;;  %v1980_v6 = vpack.c.bf16 %v1271_v62, %v1271_v62  ;;  %v1269_v38 = vmul.f32 %v2458_v34, %v3176_v12 }
 0x181   : > { %v2462_v32 = vpop.eup %2461  ;;  %1619 = vst.msk [vmem:[%s2834_s18 + $0xe4] sm:$0xf] %vm1561_vm3, %v2007_v52  ;;  %v2012_v4 = vpack.c.bf16 %v1303_v60, %v1303_v60  ;;  %v1301_v11 = vmul.f32 %v2460_v51, %v3179_v9 }
 0x182   : > { %v2464_v24 = vpop.eup %2463  ;;  %1592 = vst.msk [vmem:[%s2834_s18 + $0x78] sm:$0xf] %vm1561_vm3, %v1980_v6  ;;  %v1978_v13 = vpack.c.bf16 %v1269_v38, %v1269_v38  ;;  %v1272_v44 = vmul.f32 %v2462_v32, %v3193_v0 }
 0x183   : > { %v2466_v2 = vpop.eup %2465  ;;  %1624 = vst.msk [vmem:[%s2834_s18 + $0xf8] sm:$0xf] %vm1561_vm3, %v2012_v4  ;;  %v2010_v12 = vpack.c.bf16 %v1301_v11, %v1301_v11  ;;  %v1304_v17 = vmul.f32 %v2464_v24, %v3197_v26 }
 0x184   : > { %v2468_v9 = vpop.eup %2467  ;;  %1590 = vst.msk [vmem:[%s2834_s18 + $0x70] sm:$0xf] %vm1561_vm3, %v1978_v13  ;;  %v1981_v21 = vpack.c.bf16 %v1272_v44, %v1272_v44  ;;  %v1270_v5 = vmul.f32 %v2466_v2, %v3203_v35 }
 0x185   : > { %1622 = vst.msk [vmem:[%s2834_s18 + $0xf0] sm:$0xf] %vm1561_vm3, %v2010_v12  ;;  %v2013_v0 = vpack.c.bf16 %v1304_v17, %v1304_v17  ;;  %v1302_v20 = vmul.f32 %v2468_v9, %v3209_v55 }
 0x186   : > { %1593 = vst.msk [vmem:[%s2834_s18 + $0x7c] sm:$0xf] %vm1561_vm3, %v1981_v21  ;;  %v1979_v26 = vpack.c.bf16 %v1270_v5, %v1270_v5 }
 0x187   : > { %1625 = vst.msk [vmem:[%s2834_s18 + $0xfc] sm:$0xf] %vm1561_vm3, %v2013_v0  ;;  %v2011_v35 = vpack.c.bf16 %v1302_v20, %v1302_v20 }
 0x188   : > { %1591 = vst.msk [vmem:[%s2834_s18 + $0x74] sm:$0xf] %vm1561_vm3, %v1979_v26 }
 0x189   : > { %1623 = vst.msk [vmem:[%s2834_s18 + $0xf4] sm:$0xf] %vm1561_vm3, %v2011_v35 }
 0x18a   : > { %2483 = shalt.err (!%p2480_p5)
}
 0x18b   : > { %s2484_s7 = scalar_lea.hbm %s3277_s28, 4096  ;;  %s2488_s10 = scalar_lea.hbm %s3340_s3, 16384 }
 0x18c   : > { %p2485_p6 = scmp.ne.s32.totalorder %s3277_s28, %s2484_s7  ;;  %p2489_p10 = scmp.lt.u32.totalorder %s3277_s28, %s3340_s3 }
 0x18d   : > { %p2490_p11 = scmp.lt.u32.totalorder %s2488_s10, %s2484_s7  ;;  %p2492_p13 = scmp.lt.u32.totalorder %s2484_s7, %s3277_s28 }
 0x18e   : > { %p2486_p7 = pnand %p2485_p6, %p2614_p4 }
 0x18f   : > { %p2491_p12 = por %p2490_p11, %p2489_p10 }
 0x190   : > { %p2487_p9 = pneg %p2486_p7 }
 0x191   : > { %p2493_p0 = por %p2492_p13, %p2491_p12 }
 0x193   : > { %p2494_p1 = pnand %p2493_p0, %p2487_p9 }
 0x195   : > { %2497 = shalt.err (!%p2494_p1)
}
 0x196   : > { %s2552_s19 = smov 64   ;;  %s2553_s21 = smov 4  }
 0x197   : > { %2121 = dma.vmem_to_hbm [thread:$0]  (%p2614_p4), %s3281_s26, 4096, %s3277_s28, %s3291_s29, %s2552_s19, %s2552_s19, %s2553_s21  }
 0x198 PF: > { %p2127_p2 = scmp.ge.s32.totalorder %s2548_s17, 2  ;;  %s1656_s23 = sand.u32 1, %s2528_s12  }
 0x199   : > { %s1657_s15 = scalar_lea.sflag [#allocation3], %s1656_s23 }
 0x19a   : > { %p2124_p3 = pnand %p2127_p2, %p2621_p8 }
 0x19c   : > { %2523 = dma.done.wait (!%p2124_p3), %s1657_s15, 4096  }
 0x19d   : > { %2525 = vsyncadd (!%p2124_p3), %s1657_s15, 4294963200  ;;  %s16_s17 = sadd.s32 1, %s2548_s17   ;;  %s3347_s12 = smov %s2532_s13 }
 0x19e   : > { %p13_p5 = scmp.ge.s32.totalorder %s16_s17, 6   ;;  %s3348_s13 = smov %s2536_s14 }
 0x19f   : > { %s3349_s14 = smov %s2627_s25  ;;  %s3350_s15 = smov %s2544_s16 }
 0x1a0   : > { %s3351_s16 = smov %s3353_s20  ;;  %15 = sbr.rel (!%p13_p5) target bundleno = 4 (0x4), region = 73 }
 0x1a7   :  { %1662 = vsyncpa [#allocation3], 1 }
 0x1a8   :  { %1664 = vsyncpa [#allocation3 + $0x1], 1 }

</bundles_post_ra>
